<compile_context>
chip_gen: v5e
topology: v5e:2x2
jax: 0.10.0
libtpu: 0.0.40
codegen_flags: <defaults>
</compile_context>

<pallas_src>
import functools
import math

import jax
import jax.numpy as jnp
from jax.experimental import pallas as pl
from jax.experimental.pallas import tpu as pltpu


def _reflect_conv_kernel(x_ref, w_ref, b_ref, o_ref, xp_ref, *, kh, kw, pad):
    """Fused ReflectionPad2d(pad) + Conv2d(kh x kw, stride=1) for one batch element.

    x_ref : (1, H, W, Cin)            NHWC input tile
    w_ref : (kh*kw, Cin, Cout)        conv taps, row-major (dh, dw)
    b_ref : (1, Cout)
    o_ref : (1, Ho, Wo, Cout)         Ho = H + 2*pad - kh + 1 (stride-1 "valid")
    xp_ref: (H+2*pad, W+2*pad, Cin)   VMEM scratch: the reflect-padded plane
    """
    H, W, Cin = x_ref.shape[1], x_ref.shape[2], x_ref.shape[3]
    Ho, Wo, Cout = o_ref.shape[1], o_ref.shape[2], o_ref.shape[3]

    # ---- build the reflect-padded plane in VMEM scratch (static slices only) ----
    xp_ref[pad:pad + H, pad:pad + W, :] = x_ref[0]
    for i in range(pad):  # rows: reflect about the first/last interior row
        xp_ref[i:i + 1, pad:pad + W, :] = x_ref[0, pad - i:pad - i + 1, :, :]
        xp_ref[pad + H + i:pad + H + i + 1, pad:pad + W, :] = (
            x_ref[0, H - 2 - i:H - 1 - i, :, :])
    for j in range(pad):  # cols: reflect the already row-padded plane (fixes corners)
        xp_ref[:, j:j + 1, :] = xp_ref[:, 2 * pad - j:2 * pad - j + 1, :]
        xp_ref[:, pad + W + j:pad + W + j + 1, :] = (
            xp_ref[:, pad + W - 2 - j:pad + W - 1 - j, :])

    # ---- k*k full-image matmuls: (Ho*Wo, Cin) @ (Cin, Cout), f32 accumulation ----
    acc = jnp.zeros((Ho * Wo, Cout), jnp.float32)
    for dh in range(kh):
        for dw in range(kw):
            patch = xp_ref[dh:dh + Ho, dw:dw + Wo, :]      # contiguous static slice
            acc = acc + jnp.dot(patch.reshape(Ho * Wo, Cin),
                                w_ref[dh * kw + dw],
                                preferred_element_type=jnp.float32)

    out = acc + b_ref[...].astype(jnp.float32)             # single bias broadcast
    o_ref[...] = out.reshape(1, Ho, Wo, Cout).astype(o_ref.dtype)


def conv_layer_forward(x_nchw, weight_oihw, bias, *, kernel_size, stride):
    """Pallas forward of ConvLayer: ReflectionPad2d(k//2) + Conv2d(k, stride).

    x_nchw:      (N, Cin, H, W) float32          (PyTorch NCHW convention)
    weight_oihw: (Cout, Cin, k, k)               (PyTorch Conv2d weight layout)
    bias:        (Cout,)
    returns:     (N, Cout, Ho, Wo), Ho = (H + 2*(k//2) - k)//stride + 1
    """
    N, Cin, H, W = x_nchw.shape
    Cout = weight_oihw.shape[0]
    k = kernel_size
    pad = k // 2
    Ho1 = H + 2 * pad - k + 1      # stride-1 output extent
    Wo1 = W + 2 * pad - k + 1

    x = jnp.transpose(x_nchw, (0, 2, 3, 1)).astype(jnp.float32)            # NHWC
    w = jnp.transpose(weight_oihw, (2, 3, 1, 0)).reshape(k * k, Cin, Cout)
    w = w.astype(jnp.float32)
    b = bias.reshape(1, Cout).astype(jnp.float32)

    kernel = functools.partial(_reflect_conv_kernel, kh=k, kw=k, pad=pad)
    out = pl.pallas_call(
        kernel,
        out_shape=jax.ShapeDtypeStruct((N, Ho1, Wo1, Cout), jnp.float32),
        grid=(N,),
        in_specs=[
            pl.BlockSpec((1, H, W, Cin), lambda n: (n, 0, 0, 0)),
            pl.BlockSpec((k * k, Cin, Cout), lambda n: (0, 0, 0)),
            pl.BlockSpec((1, Cout), lambda n: (0, 0)),
        ],
        out_specs=pl.BlockSpec((1, Ho1, Wo1, Cout), lambda n: (n, 0, 0, 0)),
        scratch_shapes=[pltpu.VMEM((H + 2 * pad, W + 2 * pad, Cin), jnp.float32)],
        compiler_params=pltpu.CompilerParams(dimension_semantics=("parallel",)),
    )(x, w, b)

    if stride > 1:
        # A stride-s conv over the padded input equals the stride-1 conv subsampled
        # at [::s, ::s]; exact semantics, negligible waste at these sizes.
        # TODO(synk): fold the stride into the in-kernel tap slicing for large inputs.
        out = out[:, ::stride, ::stride, :]

    return jnp.transpose(out, (0, 3, 1, 2))                                # NCHW


def conv_layer_reference(x_nchw, weight_oihw, bias, *, kernel_size, stride):
    """Plain-JAX reference matching torch ReflectionPad2d + Conv2d."""
    pad = kernel_size // 2
    xp = jnp.pad(x_nchw, ((0, 0), (0, 0), (pad, pad), (pad, pad)), mode="reflect")
    out = jax.lax.conv_general_dilated(
        xp, weight_oihw, window_strides=(stride, stride), padding="VALID",
        dimension_numbers=("NCHW", "OIHW", "NCHW"))
    return out + bias.reshape(1, -1, 1, 1)


if __name__ == "__main__":
    key = jax.random.PRNGKey(0)
    kx, kw_, kb = jax.random.split(key, 3)

    # ConvLayer(in_channels=4, out_channels=128, kernel_size=3, stride=1)
    N, Cin, H, W = 2, 4, 16, 16
    Cout, K = 128, 3
    fan_in = Cin * K * K
    bound = 1.0 / math.sqrt(fan_in)          # PyTorch Conv2d default init range
    x = jax.random.normal(kx, (N, Cin, H, W), jnp.float32)
    weight = jax.random.uniform(kw_, (Cout, Cin, K, K), jnp.float32, -bound, bound)
    bias = jax.random.uniform(kb, (Cout,), jnp.float32, -bound, bound)

    # stride = 1
    fwd1 = jax.jit(functools.partial(conv_layer_forward, kernel_size=K, stride=1))
    out1 = jax.block_until_ready(fwd1(x, weight, bias))
    ref1 = conv_layer_reference(x, weight, bias, kernel_size=K, stride=1)
    assert out1.shape == (N, Cout, H, W), out1.shape
    assert bool(jnp.isfinite(out1).all())
    assert bool(jnp.allclose(out1, ref1, rtol=2e-2, atol=2e-2)), \
        float(jnp.max(jnp.abs(out1 - ref1)))

    # stride = 2 (exercises the module's stride parameter)
    fwd2 = jax.jit(functools.partial(conv_layer_forward, kernel_size=K, stride=2))
    out2 = jax.block_until_ready(fwd2(x, weight, bias))
    ref2 = conv_layer_reference(x, weight, bias, kernel_size=K, stride=2)
    assert out2.shape == (N, Cout, 8, 8), out2.shape
    assert bool(jnp.allclose(out2, ref2, rtol=2e-2, atol=2e-2)), \
        float(jnp.max(jnp.abs(out2 - ref2)))

    print("KERNEL_OK")
</pallas_src>

<mosaic_0001>
module attributes {stable_mosaic.version = 11 : i64} {
  func.func @_reflect_conv_kernel(%arg0: i32, %arg1: memref<1x16x16x4xf32, #tpu.memory_space<vmem>>, %arg2: memref<9x4x128xf32, #tpu.memory_space<vmem>>, %arg3: memref<1x128xf32, #tpu.memory_space<vmem>>, %arg4: memref<1x16x16x128xf32, #tpu.memory_space<vmem>>, %arg5: memref<18x18x4xf32, #tpu.memory_space<vmem>>) attributes {dimension_semantics = [#tpu.dimension_semantics<parallel>], iteration_bounds = array<i64: 2>, scalar_prefetch = 0 : i64, scratch_operands = 1 : i64, tpu.core_type = #tpu.core_type<tc>, window_params = [{transform_indices = @transform_0, window_bounds = array<i64: 1, 16, 16, 4>}, {pipeline_mode = #tpu.pipeline_mode<synchronous>, transform_indices = @transform_1, window_bounds = array<i64: 9, 4, 128>}, {pipeline_mode = #tpu.pipeline_mode<synchronous>, transform_indices = @transform_2, window_bounds = array<i64: 1, 128>}, {transform_indices = @transform_3, window_bounds = array<i64: 1, 16, 16, 128>}]} {
    %c0 = arith.constant 0 : index
    %c0_0 = arith.constant 0 : index
    %c0_1 = arith.constant 0 : index
    %c0_2 = arith.constant 0 : index
    %0 = vector.load %arg1[%c0, %c0_0, %c0_1, %c0_2] : memref<1x16x16x4xf32, #tpu.memory_space<vmem>>, vector<1x16x16x4xf32>
    %1 = vector.shape_cast %0 : vector<1x16x16x4xf32> to vector<16x16x4xf32>
    %c1 = arith.constant 1 : index
    %c1_3 = arith.constant 1 : index
    %c0_4 = arith.constant 0 : index
    %2 = vector.load %arg5[%c1, %c1_3, %c0_4] : memref<18x18x4xf32, #tpu.memory_space<vmem>>, vector<16x16x4xf32>
    tpu.vector_store %arg5[%c1, %c1_3, %c0_4], %1 {strides = array<i32>} : memref<18x18x4xf32, #tpu.memory_space<vmem>>, vector<16x16x4xf32>,
    %c0_5 = arith.constant 0 : index
    %c1_6 = arith.constant 1 : index
    %c0_7 = arith.constant 0 : index
    %c0_8 = arith.constant 0 : index
    %3 = vector.load %arg1[%c0_5, %c1_6, %c0_7, %c0_8] : memref<1x16x16x4xf32, #tpu.memory_space<vmem>>, vector<1x1x16x4xf32>
    %4 = vector.shape_cast %3 : vector<1x1x16x4xf32> to vector<1x16x4xf32>
    %c0_9 = arith.constant 0 : index
    %c1_10 = arith.constant 1 : index
    %c0_11 = arith.constant 0 : index
    %5 = vector.load %arg5[%c0_9, %c1_10, %c0_11] : memref<18x18x4xf32, #tpu.memory_space<vmem>>, vector<1x16x4xf32>
    tpu.vector_store %arg5[%c0_9, %c1_10, %c0_11], %4 {strides = array<i32>} : memref<18x18x4xf32, #tpu.memory_space<vmem>>, vector<1x16x4xf32>,
    %c0_12 = arith.constant 0 : index
    %c14 = arith.constant 14 : index
    %c0_13 = arith.constant 0 : index
    %c0_14 = arith.constant 0 : index
    %6 = vector.load %arg1[%c0_12, %c14, %c0_13, %c0_14] : memref<1x16x16x4xf32, #tpu.memory_space<vmem>>, vector<1x1x16x4xf32>
    %7 = vector.shape_cast %6 : vector<1x1x16x4xf32> to vector<1x16x4xf32>
    %c17 = arith.constant 17 : index
    %c1_15 = arith.constant 1 : index
    %c0_16 = arith.constant 0 : index
    %8 = vector.load %arg5[%c17, %c1_15, %c0_16] : memref<18x18x4xf32, #tpu.memory_space<vmem>>, vector<1x16x4xf32>
    tpu.vector_store %arg5[%c17, %c1_15, %c0_16], %7 {strides = array<i32>} : memref<18x18x4xf32, #tpu.memory_space<vmem>>, vector<1x16x4xf32>,
    %c0_17 = arith.constant 0 : index
    %c2 = arith.constant 2 : index
    %c0_18 = arith.constant 0 : index
    %9 = vector.load %arg5[%c0_17, %c2, %c0_18] : memref<18x18x4xf32, #tpu.memory_space<vmem>>, vector<18x1x4xf32>
    %c0_19 = arith.constant 0 : index
    %c0_20 = arith.constant 0 : index
    %c0_21 = arith.constant 0 : index
    %10 = vector.load %arg5[%c0_19, %c0_20, %c0_21] : memref<18x18x4xf32, #tpu.memory_space<vmem>>, vector<18x1x4xf32>
    tpu.vector_store %arg5[%c0_19, %c0_20, %c0_21], %9 {strides = array<i32>} : memref<18x18x4xf32, #tpu.memory_space<vmem>>, vector<18x1x4xf32>,
    %c0_22 = arith.constant 0 : index
    %c15 = arith.constant 15 : index
    %c0_23 = arith.constant 0 : index
    %11 = vector.load %arg5[%c0_22, %c15, %c0_23] : memref<18x18x4xf32, #tpu.memory_space<vmem>>, vector<18x1x4xf32>
    %c0_24 = arith.constant 0 : index
    %c17_25 = arith.constant 17 : index
    %c0_26 = arith.constant 0 : index
    %12 = vector.load %arg5[%c0_24, %c17_25, %c0_26] : memref<18x18x4xf32, #tpu.memory_space<vmem>>, vector<18x1x4xf32>
    tpu.vector_store %arg5[%c0_24, %c17_25, %c0_26], %11 {strides = array<i32>} : memref<18x18x4xf32, #tpu.memory_space<vmem>>, vector<18x1x4xf32>,
    %cst = arith.constant 0.000000e+00 : f32
    %13 = vector.broadcast %cst : f32 to vector<256x128xf32>
    %c0_27 = arith.constant 0 : index
    %c0_28 = arith.constant 0 : index
    %c0_29 = arith.constant 0 : index
    %14 = vector.load %arg5[%c0_27, %c0_28, %c0_29] : memref<18x18x4xf32, #tpu.memory_space<vmem>>, vector<16x16x4xf32>
    %15 = vector.shape_cast %14 : vector<16x16x4xf32> to vector<256x4xf32>
    %c0_30 = arith.constant 0 : index
    %c0_31 = arith.constant 0 : index
    %c0_32 = arith.constant 0 : index
    %16 = vector.load %arg2[%c0_30, %c0_31, %c0_32] : memref<9x4x128xf32, #tpu.memory_space<vmem>>, vector<1x4x128xf32>
    %17 = vector.shape_cast %16 : vector<1x4x128xf32> to vector<4x128xf32>
    %cst_33 = arith.constant dense<0.000000e+00> : vector<256x128xf32>
    %18 = tpu.matmul %15, %17, %cst_33 {dimension_numbers = #tpu.dot_dimension_numbers<[1], [0], [0], [1], [0, 0, 1, 1], [], []>} : vector<256x4xf32>, vector<4x128xf32>, vector<256x128xf32> -> vector<256x128xf32>
    %19 = arith.addf %13, %18 : vector<256x128xf32>
    %c0_34 = arith.constant 0 : index
    %c1_35 = arith.constant 1 : index
    %c0_36 = arith.constant 0 : index
    %20 = vector.load %arg5[%c0_34, %c1_35, %c0_36] : memref<18x18x4xf32, #tpu.memory_space<vmem>>, vector<16x16x4xf32>
    %21 = vector.shape_cast %20 : vector<16x16x4xf32> to vector<256x4xf32>
    %c1_37 = arith.constant 1 : index
    %c0_38 = arith.constant 0 : index
    %c0_39 = arith.constant 0 : index
    %22 = vector.load %arg2[%c1_37, %c0_38, %c0_39] : memref<9x4x128xf32, #tpu.memory_space<vmem>>, vector<1x4x128xf32>
    %23 = vector.shape_cast %22 : vector<1x4x128xf32> to vector<4x128xf32>
    %cst_40 = arith.constant dense<0.000000e+00> : vector<256x128xf32>
    %24 = tpu.matmul %21, %23, %cst_40 {dimension_numbers = #tpu.dot_dimension_numbers<[1], [0], [0], [1], [0, 0, 1, 1], [], []>} : vector<256x4xf32>, vector<4x128xf32>, vector<256x128xf32> -> vector<256x128xf32>
    %25 = arith.addf %19, %24 : vector<256x128xf32>
    %c0_41 = arith.constant 0 : index
    %c2_42 = arith.constant 2 : index
    %c0_43 = arith.constant 0 : index
    %26 = vector.load %arg5[%c0_41, %c2_42, %c0_43] : memref<18x18x4xf32, #tpu.memory_space<vmem>>, vector<16x16x4xf32>
    %27 = vector.shape_cast %26 : vector<16x16x4xf32> to vector<256x4xf32>
    %c2_44 = arith.constant 2 : index
    %c0_45 = arith.constant 0 : index
    %c0_46 = arith.constant 0 : index
    %28 = vector.load %arg2[%c2_44, %c0_45, %c0_46] : memref<9x4x128xf32, #tpu.memory_space<vmem>>, vector<1x4x128xf32>
    %29 = vector.shape_cast %28 : vector<1x4x128xf32> to vector<4x128xf32>
    %cst_47 = arith.constant dense<0.000000e+00> : vector<256x128xf32>
    %30 = tpu.matmul %27, %29, %cst_47 {dimension_numbers = #tpu.dot_dimension_numbers<[1], [0], [0], [1], [0, 0, 1, 1], [], []>} : vector<256x4xf32>, vector<4x128xf32>, vector<256x128xf32> -> vector<256x128xf32>
    %31 = arith.addf %25, %30 : vector<256x128xf32>
    %c1_48 = arith.constant 1 : index
    %c0_49 = arith.constant 0 : index
    %c0_50 = arith.constant 0 : index
    %32 = vector.load %arg5[%c1_48, %c0_49, %c0_50] : memref<18x18x4xf32, #tpu.memory_space<vmem>>, vector<16x16x4xf32>
    %33 = vector.shape_cast %32 : vector<16x16x4xf32> to vector<256x4xf32>
    %c3 = arith.constant 3 : index
    %c0_51 = arith.constant 0 : index
    %c0_52 = arith.constant 0 : index
    %34 = vector.load %arg2[%c3, %c0_51, %c0_52] : memref<9x4x128xf32, #tpu.memory_space<vmem>>, vector<1x4x128xf32>
    %35 = vector.shape_cast %34 : vector<1x4x128xf32> to vector<4x128xf32>
    %cst_53 = arith.constant dense<0.000000e+00> : vector<256x128xf32>
    %36 = tpu.matmul %33, %35, %cst_53 {dimension_numbers = #tpu.dot_dimension_numbers<[1], [0], [0], [1], [0, 0, 1, 1], [], []>} : vector<256x4xf32>, vector<4x128xf32>, vector<256x128xf32> -> vector<256x128xf32>
    %37 = arith.addf %31, %36 : vector<256x128xf32>
    %c1_54 = arith.constant 1 : index
    %c1_55 = arith.constant 1 : index
    %c0_56 = arith.constant 0 : index
    %38 = vector.load %arg5[%c1_54, %c1_55, %c0_56] : memref<18x18x4xf32, #tpu.memory_space<vmem>>, vector<16x16x4xf32>
    %39 = vector.shape_cast %38 : vector<16x16x4xf32> to vector<256x4xf32>
    %c4 = arith.constant 4 : index
    %c0_57 = arith.constant 0 : index
    %c0_58 = arith.constant 0 : index
    %40 = vector.load %arg2[%c4, %c0_57, %c0_58] : memref<9x4x128xf32, #tpu.memory_space<vmem>>, vector<1x4x128xf32>
    %41 = vector.shape_cast %40 : vector<1x4x128xf32> to vector<4x128xf32>
    %cst_59 = arith.constant dense<0.000000e+00> : vector<256x128xf32>
    %42 = tpu.matmul %39, %41, %cst_59 {dimension_numbers = #tpu.dot_dimension_numbers<[1], [0], [0], [1], [0, 0, 1, 1], [], []>} : vector<256x4xf32>, vector<4x128xf32>, vector<256x128xf32> -> vector<256x128xf32>
    %43 = arith.addf %37, %42 : vector<256x128xf32>
    %c1_60 = arith.constant 1 : index
    %c2_61 = arith.constant 2 : index
    %c0_62 = arith.constant 0 : index
    %44 = vector.load %arg5[%c1_60, %c2_61, %c0_62] : memref<18x18x4xf32, #tpu.memory_space<vmem>>, vector<16x16x4xf32>
    %45 = vector.shape_cast %44 : vector<16x16x4xf32> to vector<256x4xf32>
    %c5 = arith.constant 5 : index
    %c0_63 = arith.constant 0 : index
    %c0_64 = arith.constant 0 : index
    %46 = vector.load %arg2[%c5, %c0_63, %c0_64] : memref<9x4x128xf32, #tpu.memory_space<vmem>>, vector<1x4x128xf32>
    %47 = vector.shape_cast %46 : vector<1x4x128xf32> to vector<4x128xf32>
    %cst_65 = arith.constant dense<0.000000e+00> : vector<256x128xf32>
    %48 = tpu.matmul %45, %47, %cst_65 {dimension_numbers = #tpu.dot_dimension_numbers<[1], [0], [0], [1], [0, 0, 1, 1], [], []>} : vector<256x4xf32>, vector<4x128xf32>, vector<256x128xf32> -> vector<256x128xf32>
    %49 = arith.addf %43, %48 : vector<256x128xf32>
    %c2_66 = arith.constant 2 : index
    %c0_67 = arith.constant 0 : index
    %c0_68 = arith.constant 0 : index
    %50 = vector.load %arg5[%c2_66, %c0_67, %c0_68] : memref<18x18x4xf32, #tpu.memory_space<vmem>>, vector<16x16x4xf32>
    %51 = vector.shape_cast %50 : vector<16x16x4xf32> to vector<256x4xf32>
    %c6 = arith.constant 6 : index
    %c0_69 = arith.constant 0 : index
    %c0_70 = arith.constant 0 : index
    %52 = vector.load %arg2[%c6, %c0_69, %c0_70] : memref<9x4x128xf32, #tpu.memory_space<vmem>>, vector<1x4x128xf32>
    %53 = vector.shape_cast %52 : vector<1x4x128xf32> to vector<4x128xf32>
    %cst_71 = arith.constant dense<0.000000e+00> : vector<256x128xf32>
    %54 = tpu.matmul %51, %53, %cst_71 {dimension_numbers = #tpu.dot_dimension_numbers<[1], [0], [0], [1], [0, 0, 1, 1], [], []>} : vector<256x4xf32>, vector<4x128xf32>, vector<256x128xf32> -> vector<256x128xf32>
    %55 = arith.addf %49, %54 : vector<256x128xf32>
    %c2_72 = arith.constant 2 : index
    %c1_73 = arith.constant 1 : index
    %c0_74 = arith.constant 0 : index
    %56 = vector.load %arg5[%c2_72, %c1_73, %c0_74] : memref<18x18x4xf32, #tpu.memory_space<vmem>>, vector<16x16x4xf32>
    %57 = vector.shape_cast %56 : vector<16x16x4xf32> to vector<256x4xf32>
    %c7 = arith.constant 7 : index
    %c0_75 = arith.constant 0 : index
    %c0_76 = arith.constant 0 : index
    %58 = vector.load %arg2[%c7, %c0_75, %c0_76] : memref<9x4x128xf32, #tpu.memory_space<vmem>>, vector<1x4x128xf32>
    %59 = vector.shape_cast %58 : vector<1x4x128xf32> to vector<4x128xf32>
    %cst_77 = arith.constant dense<0.000000e+00> : vector<256x128xf32>
    %60 = tpu.matmul %57, %59, %cst_77 {dimension_numbers = #tpu.dot_dimension_numbers<[1], [0], [0], [1], [0, 0, 1, 1], [], []>} : vector<256x4xf32>, vector<4x128xf32>, vector<256x128xf32> -> vector<256x128xf32>
    %61 = arith.addf %55, %60 : vector<256x128xf32>
    %c2_78 = arith.constant 2 : index
    %c2_79 = arith.constant 2 : index
    %c0_80 = arith.constant 0 : index
    %62 = vector.load %arg5[%c2_78, %c2_79, %c0_80] : memref<18x18x4xf32, #tpu.memory_space<vmem>>, vector<16x16x4xf32>
    %63 = vector.shape_cast %62 : vector<16x16x4xf32> to vector<256x4xf32>
    %c8 = arith.constant 8 : index
    %c0_81 = arith.constant 0 : index
    %c0_82 = arith.constant 0 : index
    %64 = vector.load %arg2[%c8, %c0_81, %c0_82] : memref<9x4x128xf32, #tpu.memory_space<vmem>>, vector<1x4x128xf32>
    %65 = vector.shape_cast %64 : vector<1x4x128xf32> to vector<4x128xf32>
    %cst_83 = arith.constant dense<0.000000e+00> : vector<256x128xf32>
    %66 = tpu.matmul %63, %65, %cst_83 {dimension_numbers = #tpu.dot_dimension_numbers<[1], [0], [0], [1], [0, 0, 1, 1], [], []>} : vector<256x4xf32>, vector<4x128xf32>, vector<256x128xf32> -> vector<256x128xf32>
    %67 = arith.addf %61, %66 : vector<256x128xf32>
    %c0_84 = arith.constant 0 : index
    %c0_85 = arith.constant 0 : index
    %68 = vector.load %arg3[%c0_84, %c0_85] : memref<1x128xf32, #tpu.memory_space<vmem>>, vector<1x128xf32>
    %69 = vector.broadcast %68 : vector<1x128xf32> to vector<256x128xf32>
    %70 = arith.addf %67, %69 : vector<256x128xf32>
    %71 = vector.shape_cast %70 : vector<256x128xf32> to vector<1x16x16x128xf32>
    %c0_86 = arith.constant 0 : index
    %c0_87 = arith.constant 0 : index
    %c0_88 = arith.constant 0 : index
    %c0_89 = arith.constant 0 : index
    %72 = vector.load %arg4[%c0_86, %c0_87, %c0_88, %c0_89] : memref<1x16x16x128xf32, #tpu.memory_space<vmem>>, vector<1x16x16x128xf32>
    tpu.vector_store %arg4[%c0_86, %c0_87, %c0_88, %c0_89], %71 {strides = array<i32>} : memref<1x16x16x128xf32, #tpu.memory_space<vmem>>, vector<1x16x16x128xf32>,
    return
  }
  func.func @transform_0(%arg0: i32) -> (i32, i32, i32, i32) {
    %c0_i32 = arith.constant 0 : i32
    %c0_i32_0 = arith.constant 0 : i32
    %c0_i32_1 = arith.constant 0 : i32
    %c0_i32_2 = arith.constant 0 : i32
    return %arg0, %c0_i32, %c0_i32_0, %c0_i32_1 : i32, i32, i32, i32
  }
  func.func @transform_1(%arg0: i32) -> (i32, i32, i32) {
    %c0_i32 = arith.constant 0 : i32
    %c0_i32_0 = arith.constant 0 : i32
    %c0_i32_1 = arith.constant 0 : i32
    %c0_i32_2 = arith.constant 0 : i32
    return %c0_i32, %c0_i32_0, %c0_i32_1 : i32, i32, i32
  }
  func.func @transform_2(%arg0: i32) -> (i32, i32) {
    %c0_i32 = arith.constant 0 : i32
    %c0_i32_0 = arith.constant 0 : i32
    %c0_i32_1 = arith.constant 0 : i32
    return %c0_i32, %c0_i32_0 : i32, i32
  }
  func.func @transform_3(%arg0: i32) -> (i32, i32, i32, i32) {
    %c0_i32 = arith.constant 0 : i32
    %c0_i32_0 = arith.constant 0 : i32
    %c0_i32_1 = arith.constant 0 : i32
    %c0_i32_2 = arith.constant 0 : i32
    return %arg0, %c0_i32, %c0_i32_0, %c0_i32_1 : i32, i32, i32, i32
  }
}

</mosaic_0001>

<bundles_post_ra>
// kernel: conv_layer_forward.1
= control target key start
LH: loop header
LB: loop body
LE: loop exit
PB: predicated region body
PF: predicated region fallthrough
CT: control target
= control target key end

     0   :  { %8 = vsyncpa [#allocation4], 0  ;;  %s4490_s0 = inlined_call_operand.vmem [shape: f32[2,16,16,4], index: 0, kind: input, shape index: {}]   ;;  %s4491_s1 = inlined_call_operand.vmem [shape: f32[9,4,128], index: 1, kind: input, shape index: {}]   ;;  %s4492_s2 = inlined_call_operand.vmem [shape: f32[1,128], index: 2, kind: input, shape index: {}]   ;;  %s4493_s3 = inlined_call_operand.hbm [shape: f32[2,16,16,128], index: 3, kind: output, shape index: {}]  }
   0x1   :  { %10 = vsyncpa [#allocation4 + $0x1], 0  ;;  %s3358_s12 = smov 0   ;;  %s3360_s13 = smov 0  }
   0x2   :  { %s3362_s14 = smov 0   ;;  %s3364_s15 = smov 0  }
   0x3 LB: > { %s3379_s16 = sadd.s32 4294967295, %s3334_s15   ;;  %s2904_s17 = sadd.s32 4294967294, %s3334_s15   ;;  %s3334_s15 = sphi %s3364_s15, %s4583_s15   ;;  %s3330_s14 = sphi %s3362_s14, %s4582_s14   ;;  %s3326_s13 = sphi %s3360_s13, %s4581_s13   ;;  %s3322_s12 = sphi %s3358_s12, %s4580_s12  }
   0x4   : > { %s3383_s18 = sadd.s32 1, %s3334_s15   ;;  %s91_s19 = sadd.s32 1, %s3330_s14 }
   0x5   : > { %s88_s20 = ssub.s32 %s3334_s15, %s3383_s18  ;;  %p101_p0 = scmp.ne.s32.totalorder %s3330_s14, %s3326_s13 }
   0x6   : > { %p89_p1 = scmp.eq.s32.totalorder %s88_s20, 0  ;;  %p102_p2 = scmp.eq.s32.totalorder %s3379_s16, 1 }
   0x7   : > { %p107_p3 = scmp.ne.s32.totalorder %s3326_s13, %s3322_s12  ;;  %p108_p4 = scmp.eq.s32.totalorder %s2904_s17, 1 }
   0x8   : > { %s3394_s21 = scalar_select %p89_p1, %s3330_s14, %s91_s19  }
   0x9   : > { %p3396_p5 = por %p102_p2, %p101_p0  ;;  %p3400_p6 = por %p108_p4, %p107_p3 }
   0xa   : > { %p2907_p7 = scmp.ge.s32.totalorder %s3334_s15, 1  ;;  %p140_p8 = scmp.lt.s32.totalorder %s3334_s15, 3 }
   0xc   : > { %p141_p9 = pnand %p2907_p7, %p140_p8 }
   0xe   : > { %144 = sbr.rel (%p141_p9) target bundleno = 747 (0x2eb), region = 32 }
  0x13   : > { %v2915_v0 = vld [vmem:[%s4491_s1 + $0x4] sm:$0xf]  ;;  %vm482_vm0 = vcmask 1043456   ;;  %p164_p10 = scmp.lt.s32.totalorder %s3379_s16, 1  ;;  %v2982_v1 = vld [vmem:[%s4491_s1 + $0x8] sm:$0xf] }
  0x14   : > { %3227 = vmatpush.msk.msra.mxu1 %vm482_vm0, %v2915_v0  ;;  %3228 = vmatpush.msk.msra.mxu2 %vm482_vm0, %v2915_v0  ;;  %v3016_v2 = vld [vmem:[%s4491_s1 + $0xc] sm:$0xf]  ;;  %v351_v3 = vld [vmem:[%s4491_s1] sm:$0xf]  ;;  %v3050_v4 = vld [vmem:[%s4491_s1 + $0x10] sm:$0xf] }
  0x15   : > { %s165_s5 = scalar_select %p164_p10, %s3379_s16, 1  ;;  %3229 = vmatpush.msk.msra.mxu3 %vm482_vm0, %v2915_v0  ;;  %vm202_vm1 = vcmask 31744   ;;  %2916 = vmatpush.msk.msra.mxu0 %vm482_vm0, %v2915_v0  ;;  %vm264_vm2 = vcmask 24576   ;;  %v3118_v57 = vld [vmem:[%s4491_s1 + $0x18] sm:$0xf] }
  0x16   : > { %2983 = vmatpush.msk.msrb.mxu2 %vm482_vm0, %v2982_v1  ;;  %2949 = vmatpush.msk.msrb.mxu1 %vm482_vm0, %v351_v3  ;;  %v3152_v59 = vld [vmem:[%s4491_s1 + $0x1c] sm:$0xf]  ;;  %v3084_v60 = vld [vmem:[%s4491_s1 + $0x14] sm:$0xf]  ;;  %v3186_v1 = vld [vmem:[%s4491_s1 + $0x20] sm:$0xf] }
  0x17   : > { %3017 = vmatpush.msk.msrb.mxu3 %vm482_vm0, %v3016_v2  ;;  %s3225_s8 = sshll.u32 %s165_s5, 8  ;;  %3051 = vmatpush.msk.msrb.mxu0 %vm482_vm0, %v3050_v4  ;;  %s161_s29 = sand.u32 1, %s3326_s13  }
  0x18   : > { %s3433_s11 = scalar_lea.vmem %s4490_s0, %s3225_s8  ;;  %s2908_s30 = sshll.u32 %s161_s29, 8 }
  0x19   : > { %v175_v5 = vld [vmem:[%s3433_s11 + $0x30] sm:$0xff]  ;;  %v176_v8 = vld [vmem:[%s3433_s11 + $0x38] sm:$0xff]  ;;  %v177_v12 = vld [vmem:[%s3433_s11 + $0x40] sm:$0xff]  ;;  %s4281_s6 = scalar_lea.vmem [#allocation3], %s2908_s30  ;;  %s3226_s7 = sshll.u32 %s3379_s16, 8 }
  0x1a   : > { %v183_v6 = vld [vmem:[%s3433_s11 + $0x70] sm:$0xff]  ;;  %209 = vst.msk [vmem:[#allocation2 + $0x61] sm:$0xff] %vm202_vm1, %v175_v5  ;;  %v184_v9 = vld [vmem:[%s3433_s11 + $0x78] sm:$0xff]  ;;  %v185_v13 = vld [vmem:[%s3433_s11 + $0x80] sm:$0xff]  ;;  %s2838_s10 = scalar_lea.hbm %s4493_s3, %s3226_s7  ;;  %s2827_s16 = scalar_lea.sflag [#allocation4], %s161_s29 }
  0x1b   : > { %v191_v7 = vld [vmem:[%s3433_s11 + $0xb0] sm:$0xff]  ;;  %217 = vst.msk [vmem:[#allocation2 + $0xc1] sm:$0xff] %vm202_vm1, %v183_v6  ;;  %v192_v11 = vld [vmem:[%s3433_s11 + $0xb8] sm:$0xff]  ;;  %v193_v16 = vld [vmem:[%s3433_s11 + $0xc0] sm:$0xff]  ;;  %s2841_s17 = sshll.u32 %s2838_s10, 4  ;;  %s3292_s26 = scalar_lea.hbm %s4493_s3, 512  ;;  %s2842_s17 = int_to_ptr.hbm [resolvable:$true] %s2841_s17 }
  0x1c   : > { %225 = vst.msk [vmem:[#allocation2 + $0x121] sm:$0xff] %vm202_vm1, %v191_v7  ;;  %v2911_v10 = vld [vmem:[%s3433_s11 + $0x10] sm:$0xff]  ;;  %v2912_v14 = vld [vmem:[%s3433_s11 + $0x18] sm:$0xff]  ;;  %v178_v18 = vld [vmem:[%s3433_s11 + $0x48] sm:$0xff]  ;;  %s3286_s19 = sshra.s32 %s2842_s17, 4  ;;  %s3287_s19 = int_to_ptr.hbm [resolvable:$true] %s3286_s19 }
  0x1d   : > { %210 = vst.msk [vmem:[#allocation2 + $0x69] sm:$0xff] %vm202_vm1, %v176_v8  ;;  %v186_v20 = vld [vmem:[%s3433_s11 + $0x88] sm:$0xff]  ;;  %v169_v21 = vld [vmem:[%s3433_s11] sm:$0xff]  ;;  %v179_v24 = vld [vmem:[%s3433_s11 + $0x50] sm:$0xff]  ;;  %s3288_s20 = scalar_lea.hbm %s3287_s19, 256  ;;  %p3293_p0 = scmp.lt.s32.totalorder %s3287_s19, %s4493_s3 }
  0x1e   : > { %218 = vst.msk [vmem:[#allocation2 + $0xc9] sm:$0xff] %vm202_vm1, %v184_v9  ;;  %v194_v22 = vld [vmem:[%s3433_s11 + $0xc8] sm:$0xff]  ;;  %v187_v26 = vld [vmem:[%s3433_s11 + $0x90] sm:$0xff]  ;;  %v180_v31 = vld [vmem:[%s3433_s11 + $0x58] sm:$0xff]  ;;  %p3289_p11 = scmp.ne.s32.totalorder %s3287_s19, %s3288_s20  ;;  %p3294_p1 = scmp.lt.s32.totalorder %s3292_s26, %s3288_s20 }
  0x1f   : > { %238 = vst.msk [vmem:[#allocation2 + $0x1] sm:$0xff] %vm202_vm1, %v2911_v10  ;;  %v170_v28 = vld [vmem:[%s3433_s11 + $0x8] sm:$0xff]  ;;  %v195_v30 = vld [vmem:[%s3433_s11 + $0xd0] sm:$0xff]  ;;  %v188_v32 = vld [vmem:[%s3433_s11 + $0x98] sm:$0xff] }
  0x20   : > { %226 = vst.msk [vmem:[#allocation2 + $0x129] sm:$0xff] %vm202_vm1, %v192_v11  ;;  %v196_v34 = vld [vmem:[%s3433_s11 + $0xd8] sm:$0xff]  ;;  %v181_v35 = vld [vmem:[%s3433_s11 + $0x60] sm:$0xff]  ;;  %v182_v41 = vld [vmem:[%s3433_s11 + $0x68] sm:$0xff]  ;;  %p3290_p12 = pnand %p3289_p11, %p3396_p5  ;;  %p3295_p2 = por %p3294_p1, %p3293_p0 }
  0x21   : > { %v3453_v15 = vld [vmem:[#allocation2 + $0x61] sm:$0xff]  ;;  %211 = vst.msk [vmem:[#allocation2 + $0x79] sm:$0xff] %vm202_vm1, %v177_v12 }
  0x22   : > { %2925 = vmatmul.msk.f32.vlgmr.msra.gmra.mxu1 %vm202_vm1, %v3453_v15  ;;  %v3459_v17 = vld [vmem:[#allocation2 + $0xc1] sm:$0xff]  ;;  %219 = vst.msk [vmem:[#allocation2 + $0xd9] sm:$0xff] %vm202_vm1, %v185_v13  ;;  %p3291_p13 = pneg %p3290_p12 }
  0x23   : > { %2933 = vmatmul.msk.f32.vlgmr.msra.gmra.mxu2 %vm202_vm1, %v3459_v17  ;;  %v3465_v19 = vld [vmem:[#allocation2 + $0x121] sm:$0xff]  ;;  %239 = vst.msk [vmem:[#allocation2 + $0x9] sm:$0xff] %vm202_vm1, %v2912_v14  ;;  %3085 = vmatpush.msk.msra.mxu1 %vm482_vm0, %v3084_v60 }
  0x24   : > { %2941 = vmatmul.msk.f32.vlgmr.msra.gmra.mxu3 %vm202_vm1, %v3465_v19  ;;  %227 = vst.msk [vmem:[#allocation2 + $0x139] sm:$0xff] %vm202_vm1, %v193_v16  ;;  %v3477_v25 = vld [vmem:[#allocation2 + $0x69] sm:$0xff]  ;;  %v189_v37 = vld [vmem:[%s3433_s11 + $0xa0] sm:$0xff]  ;;  %3119 = vmatpush.msk.msra.mxu2 %vm482_vm0, %v3118_v57  ;;  %p3296_p3 = pnand %p3295_p2, %p3291_p13 }
  0x25   : > { %212 = vst.msk [vmem:[#allocation2 + $0x81] sm:$0xff] %vm202_vm1, %v178_v18  ;;  %v3482_v27 = vld [vmem:[#allocation2 + $0xc9] sm:$0xff]  ;;  %v197_v40 = vld [vmem:[%s3433_s11 + $0xe0] sm:$0xff]  ;;  %3153 = vmatpush.msk.msra.mxu3 %vm482_vm0, %v3152_v59 }
  0x26   : > { %v352_v23 = vld [vmem:[#allocation2 + $0x1] sm:$0xff]  ;;  %220 = vst.msk [vmem:[#allocation2 + $0xe1] sm:$0xff] %vm202_vm1, %v186_v20 }
  0x27   : > { %2917 = vmatmul.msk.f32.vlgmr.msra.gmra.mxu0 %vm202_vm1, %v352_v23  ;;  %203 = vst.msk [vmem:[#allocation2 + $0x19] sm:$0xff] %vm202_vm1, %v169_v21  ;;  %v3486_v29 = vld [vmem:[#allocation2 + $0x129] sm:$0xff]  ;;  %v173_v44 = vld [vmem:[%s3433_s11 + $0x20] sm:$0xff] }
  0x28   : > { %228 = vst.msk [vmem:[#allocation2 + $0x141] sm:$0xff] %vm202_vm1, %v194_v22  ;;  %v3505_v36 = vld [vmem:[#allocation2 + $0x79] sm:$0xff]  ;;  %v190_v42 = vld [vmem:[%s3433_s11 + $0xa8] sm:$0xff]  ;;  %v246_v49 = vld [vmem:[#allocation2 + $0x2] sm:$0x1]  ;;  %3187 = vmatpush.msk.msra.mxu0 %vm482_vm0, %v3186_v1 }
  0x29   : > { %213 = vst.msk [vmem:[#allocation2 + $0x91] sm:$0xff] %vm202_vm1, %v179_v24  ;;  %v3510_v38 = vld [vmem:[#allocation2 + $0xd9] sm:$0xff]  ;;  %v198_v45 = vld [vmem:[%s3433_s11 + $0xe8] sm:$0xff]  ;;  %v250_v23 = vld [vmem:[#allocation2 + $0x62] sm:$0x1] }
  0x2a   : > { %2926 = vmatmul.msk.f32.gmra.mxu1 %vm202_vm1, %v3477_v25  ;;  %221 = vst.msk [vmem:[#allocation2 + $0xf1] sm:$0xff] %vm202_vm1, %v187_v26  ;;  %v353_v33 = vld [vmem:[#allocation2 + $0x9] sm:$0xff] }
  0x2b   : > { %2934 = vmatmul.msk.f32.gmra.mxu2 %vm202_vm1, %v3482_v27  ;;  %204 = vst.msk [vmem:[#allocation2 + $0x21] sm:$0xff] %vm202_vm1, %v170_v28  ;;  %v3513_v39 = vld [vmem:[#allocation2 + $0x139] sm:$0xff]  ;;  %v174_v51 = vld [vmem:[%s3433_s11 + $0x28] sm:$0xff] }
  0x2c   : > { %2942 = vmatmul.msk.f32.gmra.mxu3 %vm202_vm1, %v3486_v29  ;;  %229 = vst.msk [vmem:[#allocation2 + $0x151] sm:$0xff] %vm202_vm1, %v195_v30  ;;  %v3534_v46 = vld [vmem:[#allocation2 + $0x81] sm:$0xff]  ;;  %v283_v56 = vld [vmem:[#allocation2 + $0xf] sm:$0x1] }
  0x2d   : > { %214 = vst.msk [vmem:[#allocation2 + $0x99] sm:$0xff] %vm202_vm1, %v180_v31  ;;  %v3539_v47 = vld [vmem:[#allocation2 + $0xe1] sm:$0xff] }
  0x2e   : > { %222 = vst.msk [vmem:[#allocation2 + $0xf9] sm:$0xff] %vm202_vm1, %v188_v32  ;;  %v3527_v43 = vld [vmem:[#allocation2 + $0x19] sm:$0xff]  ;;  %v320_v20 = vld [vmem:[#allocation2 + $0x8] sm:$0xff] }
  0x2f   : > { %2918 = vmatmul.msk.f32.gmra.mxu0 %vm202_vm1, %v353_v33  ;;  %205 = vst.msk [vmem:[#allocation2 + $0x31] sm:$0xff] %vm202_vm1, %v2911_v10  ;;  %v3542_v48 = vld [vmem:[#allocation2 + $0x141] sm:$0xff]  ;;  %v247_v52 = vld [vmem:[#allocation2 + $0x1a] sm:$0x1] }
  0x30   : > { %230 = vst.msk [vmem:[#allocation2 + $0x159] sm:$0xff] %vm202_vm1, %v196_v34  ;;  %v3556_v53 = vld [vmem:[#allocation2 + $0x91] sm:$0xff]  ;;  %v251_v32 = vld [vmem:[#allocation2 + $0x7a] sm:$0x1] }
  0x31   : > { %215 = vst.msk [vmem:[#allocation2 + $0xa9] sm:$0xff] %vm202_vm1, %v181_v35  ;;  %v3560_v54 = vld [vmem:[#allocation2 + $0xf1] sm:$0xff]  ;;  %v287_v35 = vld [vmem:[#allocation2 + $0x6f] sm:$0x1] }
  0x32   : > { %2927 = vmatmul.msk.f32.gmra.mxu1 %vm202_vm1, %v3505_v36  ;;  %223 = vst.msk [vmem:[#allocation2 + $0x109] sm:$0xff] %vm202_vm1, %v189_v37  ;;  %v3551_v50 = vld [vmem:[#allocation2 + $0x21] sm:$0xff] }
  0x33   : > { %2935 = vmatmul.msk.f32.gmra.mxu2 %vm202_vm1, %v3510_v38  ;;  %206 = vst.msk [vmem:[#allocation2 + $0x39] sm:$0xff] %vm202_vm1, %v2912_v14  ;;  %v3562_v55 = vld [vmem:[#allocation2 + $0x151] sm:$0xff]  ;;  %v284_v6 = vld [vmem:[#allocation2 + $0x27] sm:$0x1]  ;;  %v3645_v24 = vld [vmem:[#allocation2 + $0x1a] sm:$0xff] }
  0x34   : > { %2943 = vmatmul.msk.f32.gmra.mxu3 %vm202_vm1, %v3513_v39  ;;  %231 = vst.msk [vmem:[#allocation2 + $0x169] sm:$0xff] %vm202_vm1, %v197_v40  ;;  %v3585_v61 = vld [vmem:[#allocation2 + $0x99] sm:$0xff]  ;;  %v811_v14 = vld [vmem:[#allocation2 + $0x2] sm:$0xff] }
  0x35   : > { %216 = vst.msk [vmem:[#allocation2 + $0xb1] sm:$0xff] %vm202_vm1, %v182_v41  ;;  %v3589_v62 = vld [vmem:[#allocation2 + $0xf9] sm:$0xff]  ;;  %v252_v41 = vld [vmem:[#allocation2 + $0x92] sm:$0x1] }
  0x36   : > { %224 = vst.msk [vmem:[#allocation2 + $0x111] sm:$0xff] %vm202_vm1, %v190_v42  ;;  %v3574_v58 = vld [vmem:[#allocation2 + $0x31] sm:$0xff]  ;;  %v1090_v22 = vld [vmem:[#allocation2 + $0x20] sm:$0xff] }
  0x37   : > { %2919 = vmatmul.msk.f32.gmra.mxu0 %vm202_vm1, %v3527_v43  ;;  %207 = vst.msk [vmem:[#allocation2 + $0x49] sm:$0xff] %vm202_vm1, %v173_v44  ;;  %v3591_v63 = vld [vmem:[#allocation2 + $0x159] sm:$0xff]  ;;  %v248_v2 = vld [vmem:[#allocation2 + $0x32] sm:$0x1]  ;;  %v288_v44 = vld [vmem:[#allocation2 + $0x87] sm:$0x1] }
  0x38   : > { %232 = vst.msk [vmem:[#allocation2 + $0x171] sm:$0xff] %vm202_vm1, %v198_v45  ;;  %v3604_v3 = vld [vmem:[#allocation2 + $0xa9] sm:$0xff] }
  0x39   : > { %265 = vst.msk [vmem:[#allocation2] sm:$0x1] %vm264_vm2, %v246_v49  ;;  %v3607_v4 = vld [vmem:[#allocation2 + $0x109] sm:$0xff] }
  0x3a   : > { %2928 = vmatmul.msk.f32.gmra.mxu1 %vm202_vm1, %v3534_v46  ;;  %208 = vst.msk [vmem:[#allocation2 + $0x51] sm:$0xff] %vm202_vm1, %v174_v51  ;;  %v357_v0 = vld [vmem:[#allocation2 + $0x39] sm:$0xff]  ;;  %v3707_v49 = vld [vmem:[#allocation2 + $0x68] sm:$0xff] }
  0x3b   : > { %2936 = vmatmul.msk.f32.gmra.mxu2 %vm202_vm1, %v3539_v47  ;;  %266 = vst.msk [vmem:[#allocation2 + $0x18] sm:$0x1] %vm264_vm2, %v247_v52  ;;  %v3609_v5 = vld [vmem:[#allocation2 + $0x169] sm:$0xff]  ;;  %v285_v18 = vld [vmem:[#allocation2 + $0x3f] sm:$0x1]  ;;  %v3668_v33 = vld [vmem:[#allocation2 + $0x32] sm:$0xff] }
  0x3c   : > { %2944 = vmatmul.msk.f32.gmra.mxu3 %vm202_vm1, %v3542_v48  ;;  %301 = vst.msk [vmem:[#allocation2 + $0x11] sm:$0x1] %vm264_vm2, %v283_v56  ;;  %v3618_v8 = vld [vmem:[#allocation2 + $0xb1] sm:$0xff]  ;;  %v289_v56 = vld [vmem:[#allocation2 + $0x9f] sm:$0x1] }
  0x3d   : > { %267 = vst.msk [vmem:[#allocation2 + $0x30] sm:$0x1] %vm264_vm2, %v248_v2  ;;  %v3621_v9 = vld [vmem:[#allocation2 + $0x111] sm:$0xff]  ;;  %v254_v2 = vld [vmem:[#allocation2 + $0xc2] sm:$0x1] }
  0x3e   : > { %302 = vst.msk [vmem:[#allocation2 + $0x29] sm:$0x1] %vm264_vm2, %v284_v6  ;;  %v358_v7 = vld [vmem:[#allocation2 + $0x49] sm:$0xff]  ;;  %v3659_v31 = vld [vmem:[#allocation2 + $0x38] sm:$0xff] }
  0x3f   : > { %2920 = vmatmul.msk.f32.gmra.mxu0 %vm202_vm1, %v3551_v50  ;;  %v3623_v10 = vld [vmem:[#allocation2 + $0x171] sm:$0xff]  ;;  %v249_v12 = vld [vmem:[#allocation2 + $0x4a] sm:$0x1]  ;;  %303 = vst.msk [vmem:[#allocation2 + $0x41] sm:$0x1] %vm264_vm2, %v285_v18 }
  0x40   : > { %268 = vst.msk [vmem:[#allocation2 + $0x48] sm:$0x1] %vm264_vm2, %v249_v12  ;;  %v319_v13 = vld [vmem:[#allocation2] sm:$0xff] }
  0x41   : > { %v359_v11 = vld [vmem:[#allocation2 + $0x51] sm:$0xff]  ;;  %269 = vst.msk [vmem:[#allocation2 + $0x60] sm:$0x1] %vm264_vm2, %v250_v23  ;;  %v255_v23 = vld [vmem:[#allocation2 + $0xda] sm:$0x1] }
  0x42   : > { %2929 = vmatmul.msk.f32.gmra.mxu1 %vm202_vm1, %v3556_v53  ;;  %v1089_v16 = vld [vmem:[#allocation2 + $0x18] sm:$0xff]  ;;  %v286_v28 = vld [vmem:[#allocation2 + $0x57] sm:$0x1]  ;;  %270 = vst.msk [vmem:[#allocation2 + $0x78] sm:$0x1] %vm264_vm2, %v251_v32  ;;  %v3692_v42 = vld [vmem:[#allocation2 + $0x4a] sm:$0xff] }
  0x43   : > { %2937 = vmatmul.msk.f32.gmra.mxu2 %vm202_vm1, %v3560_v54  ;;  %v812_v21 = vld [vmem:[#allocation2 + $0xa] sm:$0xff]  ;;  %304 = vst.msk [vmem:[#allocation2 + $0x59] sm:$0x1] %vm264_vm2, %v286_v28 }
  0x44   : > { %2945 = vmatmul.msk.f32.gmra.mxu3 %vm202_vm1, %v3562_v55  ;;  %v3647_v26 = vld [vmem:[#allocation2 + $0x30] sm:$0xff]  ;;  %305 = vst.msk [vmem:[#allocation2 + $0x71] sm:$0x1] %vm264_vm2, %v287_v35 }
  0x45   : > { %v3657_v30 = vld [vmem:[#allocation2 + $0x22] sm:$0xff]  ;;  %v3682_v40 = vld [vmem:[#allocation2 + $0x50] sm:$0xff]  ;;  %271 = vst.msk [vmem:[#allocation2 + $0x90] sm:$0x1] %vm264_vm2, %v252_v41 }
  0x46   : > { %v3680_v37 = vld [vmem:[#allocation2 + $0x3a] sm:$0xff]  ;;  %306 = vst.msk [vmem:[#allocation2 + $0x89] sm:$0x1] %vm264_vm2, %v288_v44  ;;  %v3804_v35 = vld [vmem:[#allocation2 + $0x92] sm:$0xff]  ;;  %v291_v44 = vld [vmem:[#allocation2 + $0xcf] sm:$0x1] }
  0x47   : > { %2921 = vmatmul.msk.f32.gmra.mxu0 %vm202_vm1, %v3574_v58  ;;  %v3670_v34 = vld [vmem:[#allocation2 + $0x48] sm:$0xff]  ;;  %307 = vst.msk [vmem:[#allocation2 + $0xa1] sm:$0x1] %vm264_vm2, %v289_v56 }
  0x48   : > { %273 = vst.msk [vmem:[#allocation2 + $0xc0] sm:$0x1] %vm264_vm2, %v254_v2 }
  0x49   : > { %v3722_v52 = vld [vmem:[#allocation2 + $0x78] sm:$0xff]  ;;  %274 = vst.msk [vmem:[#allocation2 + $0xd8] sm:$0x1] %vm264_vm2, %v255_v23  ;;  %v3827_v23 = vld [vmem:[#allocation2 + $0xb0] sm:$0xff] }
  0x4a   : > { %2930 = vmatmul.msk.f32.gmra.mxu1 %vm202_vm1, %v3585_v61  ;;  %v3705_v45 = vld [vmem:[#allocation2 + $0x52] sm:$0xff]  ;;  %4518 = vst [vmem:[#allocation6_spill] sm:$0xff] %v3722_v52 }
  0x4b   : > { %2938 = vmatmul.msk.f32.gmra.mxu2 %vm202_vm1, %v3589_v62  ;;  %v3741_v60 = vld [vmem:[#allocation2 + $0x6a] sm:$0xff]  ;;  %4528 = vst [vmem:[#allocation16_spill] sm:$0xff] %v3804_v35 }
  0x4c   : > { %2946 = vmatmul.msk.f32.gmra.mxu3 %vm202_vm1, %v3591_v63  ;;  %v3764_v12 = vld [vmem:[#allocation2 + $0x90] sm:$0xff]  ;;  %309 = vst.msk [vmem:[#allocation2 + $0xd1] sm:$0x1] %vm264_vm2, %v291_v44 }
  0x4d   : > { %4523 = vst [vmem:[#allocation11_spill] sm:$0xff] %v3764_v12 }
  0x4e   : > { %4532 = vst [vmem:[#allocation20_spill] sm:$0xff] %v3827_v23 }
  0x4f   : > { %2922 = vmatmul.msk.f32.gmra.mxu0 %vm202_vm1, %v357_v0 }
  0x52   : > { %2931 = vmatmul.msk.f32.gmra.mxu1 %vm202_vm1, %v3604_v3 }
  0x53   : > { %2939 = vmatmul.msk.f32.gmra.mxu2 %vm202_vm1, %v3607_v4 }
  0x54   : > { %2947 = vmatmul.msk.f32.gmra.mxu3 %vm202_vm1, %v3609_v5 }
  0x57   : > { %2923 = vmatmul.msk.f32.gmra.mxu0 %vm202_vm1, %v358_v7 }
  0x5a   : > { %2932 = vmatmul.msk.f32.gmra.mxu1 %vm202_vm1, %v3618_v8 }
  0x5b   : > { %2940 = vmatmul.msk.f32.gmra.mxu2 %vm202_vm1, %v3621_v9 }
  0x5c   : > { %2948 = vmatmul.msk.f32.gmra.mxu3 %vm202_vm1, %v3623_v10 }
  0x5f   : > { %2924 = vmatmul.msk.f32.gmra.mxu0 %vm202_vm1, %v359_v11 }
  0x62   : > { %2950 = vmatmul.msk.f32.vlgmr.msrb.gmra.mxu1 %vm202_vm1, %v319_v13  ;;  %v290_v13 = vld [vmem:[#allocation2 + $0xb7] sm:$0x1] }
  0x63   : > { %2984 = vmatmul.msk.f32.vlgmr.msrb.gmra.mxu2 %vm202_vm1, %v811_v14  ;;  %308 = vst.msk [vmem:[#allocation2 + $0xb9] sm:$0x1] %vm264_vm2, %v290_v13  ;;  %v3825_v13 = vld [vmem:[#allocation2 + $0x9a] sm:$0xff] }
  0x64   : > { %3018 = vmatmul.msk.f32.vlgmr.msrb.gmra.mxu3 %vm202_vm1, %v1089_v16  ;;  %4531 = vst [vmem:[#allocation19_spill] sm:$0xff] %v3825_v13 }
  0x67   : > { %3052 = vmatmul.msk.f32.vlgmr.msrb.gmra.mxu0 %vm202_vm1, %v3527_v43  ;;  %v3694_v43 = vld [vmem:[#allocation2 + $0x60] sm:$0xff] }
  0x6a   : > { %2951 = vmatmul.msk.f32.gmra.mxu1 %vm202_vm1, %v320_v20  ;;  %v3783_v20 = vld [vmem:[#allocation2 + $0x82] sm:$0xff] }
  0x6b   : > { %2985 = vmatmul.msk.f32.gmra.mxu2 %vm202_vm1, %v812_v21  ;;  %4525 = vst [vmem:[#allocation13_spill] sm:$0xff] %v3783_v20  ;;  %v3785_v21 = vld [vmem:[#allocation2 + $0x98] sm:$0xff] }
  0x6c   : > { %3019 = vmatmul.msk.f32.gmra.mxu3 %vm202_vm1, %v1090_v22  ;;  %4526 = vst [vmem:[#allocation14_spill] sm:$0xff] %v3785_v21 }
  0x6f   : > { %3053 = vmatmul.msk.f32.gmra.mxu0 %vm202_vm1, %v3551_v50  ;;  %v253_v50 = vld [vmem:[#allocation2 + $0xaa] sm:$0x1] }
  0x70   : > { %272 = vst.msk [vmem:[#allocation2 + $0xa8] sm:$0x1] %vm264_vm2, %v253_v50 }
  0x72   : > { %2952 = vmatmul.msk.f32.gmra.mxu1 %vm202_vm1, %v1089_v16 }
  0x73   : > { %2986 = vmatmul.msk.f32.gmra.mxu2 %vm202_vm1, %v3645_v24 }
  0x74   : > { %3020 = vmatmul.msk.f32.gmra.mxu3 %vm202_vm1, %v3647_v26 }
  0x77   : > { %3054 = vmatmul.msk.f32.gmra.mxu0 %vm202_vm1, %v3574_v58  ;;  %v3806_v41 = vld [vmem:[#allocation2 + $0xa8] sm:$0xff] }
  0x78   : > { %4529 = vst [vmem:[#allocation17_spill] sm:$0xff] %v3806_v41 }
  0x7a   : > { %2953 = vmatmul.msk.f32.gmra.mxu1 %vm202_vm1, %v1090_v22 }
  0x7b   : > { %2987 = vmatmul.msk.f32.gmra.mxu2 %vm202_vm1, %v3657_v30 }
  0x7c   : > { %3021 = vmatmul.msk.f32.gmra.mxu3 %vm202_vm1, %v3659_v31 }
  0x7f   : > { %3055 = vmatmul.msk.f32.gmra.mxu0 %vm202_vm1, %v357_v0  ;;  %v3743_v0 = vld [vmem:[#allocation2 + $0x80] sm:$0xff] }
  0x80   : > { %4520 = vst [vmem:[#allocation8_spill] sm:$0xff] %v3743_v0 }
  0x82   : > { %2954 = vmatmul.msk.f32.gmra.mxu1 %vm202_vm1, %v3647_v26 }
  0x83   : > { %2988 = vmatmul.msk.f32.gmra.mxu2 %vm202_vm1, %v3668_v33 }
  0x84   : > { %3022 = vmatmul.msk.f32.gmra.mxu3 %vm202_vm1, %v3670_v34 }
  0x87   : > { %3056 = vmatmul.msk.f32.gmra.mxu0 %vm202_vm1, %v358_v7 }
  0x8a   : > { %2955 = vmatmul.msk.f32.gmra.mxu1 %vm202_vm1, %v3659_v31 }
  0x8b   : > { %2989 = vmatmul.msk.f32.gmra.mxu2 %vm202_vm1, %v3680_v37 }
  0x8c   : > { %3023 = vmatmul.msk.f32.gmra.mxu3 %vm202_vm1, %v3682_v40 }
  0x8f   : > { %3057 = vmatmul.msk.f32.gmra.mxu0 %vm202_vm1, %v359_v11  ;;  %v3762_v11 = vld [vmem:[#allocation2 + $0x7a] sm:$0xff] }
  0x90   : > { %4522 = vst [vmem:[#allocation10_spill] sm:$0xff] %v3762_v11 }
  0x92   : > { %2956 = vmatmul.msk.f32.gmra.mxu1 %vm202_vm1, %v3670_v34 }
  0x93   : > { %2990 = vmatmul.msk.f32.gmra.mxu2 %vm202_vm1, %v3692_v42 }
  0x94   : > { %3024 = vmatmul.msk.f32.gmra.mxu3 %vm202_vm1, %v3694_v43 }
  0x97   : > { %3058 = vmatmul.msk.f32.gmra.mxu0 %vm202_vm1, %v3453_v15  ;;  %v3720_v15 = vld [vmem:[#allocation2 + $0x62] sm:$0xff] }
  0x9a   : > { %2957 = vmatmul.msk.f32.gmra.mxu1 %vm202_vm1, %v3682_v40 }
  0x9b   : > { %2991 = vmatmul.msk.f32.gmra.mxu2 %vm202_vm1, %v3705_v45 }
  0x9c   : > { %3025 = vmatmul.msk.f32.gmra.mxu3 %vm202_vm1, %v3707_v49 }
  0x9f   : > { %v3716_v51 = vpop.f32.mrf.mxu1  ;;  %3059 = vmatmul.msk.f32.gmra.mxu0 %vm202_vm1, %v3477_v25 }
  0xa2   : > { %2958 = vmatmul.msk.f32.gmra.mxu1 %vm202_vm1, %v3694_v43 }
  0xa3   : > { %2992 = vmatmul.msk.f32.gmra.mxu2 %vm202_vm1, %v3720_v15 }
  0xa4   : > { %3026 = vmatmul.msk.f32.gmra.mxu3 %vm202_vm1, %v3722_v52  ;;  %v3731_v57 = vpop.f32.mrf.mxu0 }
  0xa6   : > { %v3733_v58 = vpop.f32.mrf.mxu2 }
  0xa7   : > { %v3735_v25 = vpop.f32.mrf.mxu1  ;;  %v3737_v59 = vpop.f32.mrf.mxu3  ;;  %3060 = vmatmul.msk.f32.gmra.mxu0 %vm202_vm1, %v3505_v36 }
  0xa8   : > { %4519 = vst [vmem:[#allocation7_spill] sm:$0xff] %v3737_v59  ;;  %v3869_v59 = vld [vmem:[#allocation2 + $0xc8] sm:$0xff] }
  0xa9   : > { %4539 = vst [vmem:[#allocation27_spill] sm:$0xff] %v3869_v59 }
  0xaa   : > { %2959 = vmatmul.msk.f32.gmra.mxu1 %vm202_vm1, %v3707_v49 }
  0xab   : > { %2993 = vmatmul.msk.f32.gmra.mxu2 %vm202_vm1, %v3741_v60 }
  0xac   : > { %3027 = vmatmul.msk.f32.gmra.mxu3 %vm202_vm1, %v3743_v0  ;;  %v3751_v1 = vpop.f32.mrf.mxu0 }
  0xae   : > { %v3754_v6 = vpop.f32.mrf.mxu2 }
  0xaf   : > { %v3756_v36 = vpop.f32.mrf.mxu1  ;;  %v3758_v7 = vpop.f32.mrf.mxu3  ;;  %3061 = vmatmul.msk.f32.gmra.mxu0 %vm202_vm1, %v3534_v46 }
  0xb0   : > { %4521 = vst [vmem:[#allocation9_spill] sm:$0xff] %v3758_v7  ;;  %v3846_v7 = vld [vmem:[#allocation2 + $0xaa] sm:$0xff] }
  0xb1   : > { %4534 = vst [vmem:[#allocation22_spill] sm:$0xff] %v3846_v7 }
  0xb2   : > { %2960 = vmatmul.msk.f32.gmra.mxu1 %vm202_vm1, %v3722_v52  ;;  %v3902_v52 = vld [vmem:[#allocation2 + $0xe0] sm:$0xff] }
  0xb3   : > { %2994 = vmatmul.msk.f32.gmra.mxu2 %vm202_vm1, %v3762_v11 }
  0xb4   : > { %3028 = vmatmul.msk.f32.gmra.mxu3 %vm202_vm1, %v3764_v12  ;;  %v3773_v14 = vpop.f32.mrf.mxu0 }
  0xb6   : > { %v3775_v16 = vpop.f32.mrf.mxu2 }
  0xb7   : > { %v3777_v46 = vpop.f32.mrf.mxu1  ;;  %v3779_v18 = vpop.f32.mrf.mxu3  ;;  %3062 = vmatmul.msk.f32.gmra.mxu0 %vm202_vm1, %v3556_v53 }
  0xb8   : > { %4524 = vst [vmem:[#allocation12_spill] sm:$0xff] %v3779_v18 }
  0xba   : > { %2961 = vmatmul.msk.f32.gmra.mxu1 %vm202_vm1, %v3743_v0 }
  0xbb   : > { %2995 = vmatmul.msk.f32.gmra.mxu2 %vm202_vm1, %v3783_v20  ;;  %v3888_v20 = vld [vmem:[#allocation2 + $0xd8] sm:$0xff] }
  0xbc   : > { %3029 = vmatmul.msk.f32.gmra.mxu3 %vm202_vm1, %v3785_v21  ;;  %v3793_v22 = vpop.f32.mrf.mxu0 }
  0xbe   : > { %v3796_v28 = vpop.f32.mrf.mxu2 }
  0xbf   : > { %v3798_v53 = vpop.f32.mrf.mxu1  ;;  %v3800_v32 = vpop.f32.mrf.mxu3  ;;  %3063 = vmatmul.msk.f32.gmra.mxu0 %vm202_vm1, %v3585_v61 }
  0xc0   : > { %4527 = vst [vmem:[#allocation15_spill] sm:$0xff] %v3800_v32  ;;  %v256_v32 = vld [vmem:[#allocation2 + $0xf2] sm:$0x1] }
  0xc1   : > { %275 = vst.msk [vmem:[#allocation2 + $0xf0] sm:$0x1] %vm264_vm2, %v256_v32 }
  0xc2   : > { %2962 = vmatmul.msk.f32.gmra.mxu1 %vm202_vm1, %v3764_v12 }
  0xc3   : > { %2996 = vmatmul.msk.f32.gmra.mxu2 %vm202_vm1, %v3804_v35 }
  0xc4   : > { %3030 = vmatmul.msk.f32.gmra.mxu3 %vm202_vm1, %v3806_v41  ;;  %v3815_v50 = vpop.f32.mrf.mxu0 }
  0xc6   : > { %v3817_v56 = vpop.f32.mrf.mxu2 }
  0xc7   : > { %v3819_v61 = vpop.f32.mrf.mxu1  ;;  %v3821_v2 = vpop.f32.mrf.mxu3  ;;  %3064 = vmatmul.msk.f32.gmra.mxu0 %vm202_vm1, %v3604_v3 }
  0xc8   : > { %4530 = vst [vmem:[#allocation18_spill] sm:$0xff] %v3821_v2 }
  0xca   : > { %2963 = vmatmul.msk.f32.gmra.mxu1 %vm202_vm1, %v3785_v21  ;;  %v292_v21 = vld [vmem:[#allocation2 + $0xe7] sm:$0x1] }
  0xcb   : > { %2997 = vmatmul.msk.f32.gmra.mxu2 %vm202_vm1, %v3825_v13  ;;  %v3848_v13 = vld [vmem:[#allocation2 + $0xc0] sm:$0xff]  ;;  %310 = vst.msk [vmem:[#allocation2 + $0xe9] sm:$0x1] %vm264_vm2, %v292_v21 }
  0xcc   : > { %3031 = vmatmul.msk.f32.gmra.mxu3 %vm202_vm1, %v3827_v23  ;;  %v3835_v44 = vpop.f32.mrf.mxu0  ;;  %4535 = vst [vmem:[#allocation23_spill] sm:$0xff] %v3848_v13 }
  0xce   : > { %v3838_v2 = vpop.f32.mrf.mxu2 }
  0xcf   : > { %v3840_v3 = vpop.f32.mrf.mxu1  ;;  %v3842_v18 = vpop.f32.mrf.mxu3  ;;  %3065 = vmatmul.msk.f32.gmra.mxu0 %vm202_vm1, %v3618_v8 }
  0xd0   : > { %4533 = vst [vmem:[#allocation21_spill] sm:$0xff] %v3842_v18 }
  0xd2   : > { %2964 = vmatmul.msk.f32.gmra.mxu1 %vm202_vm1, %v3806_v41  ;;  %v3867_v41 = vld [vmem:[#allocation2 + $0xb2] sm:$0xff] }
  0xd3   : > { %2998 = vmatmul.msk.f32.gmra.mxu2 %vm202_vm1, %v3846_v7  ;;  %4538 = vst [vmem:[#allocation26_spill] sm:$0xff] %v3867_v41  ;;  %v257_v7 = vld [vmem:[#allocation2 + $0x10a] sm:$0x1] }
  0xd4   : > { %3032 = vmatmul.msk.f32.gmra.mxu3 %vm202_vm1, %v3848_v13  ;;  %v3857_v32 = vpop.f32.mrf.mxu0  ;;  %276 = vst.msk [vmem:[#allocation2 + $0x108] sm:$0x1] %vm264_vm2, %v257_v7 }
  0xd6   : > { %v3859_v18 = vpop.f32.mrf.mxu2 }
  0xd7   : > { %4536 = vst [vmem:[#allocation24_spill] sm:$0xff] %v3859_v18  ;;  %v3861_v8 = vpop.f32.mrf.mxu1  ;;  %v3863_v35 = vpop.f32.mrf.mxu3  ;;  %3066 = vmatmul.msk.f32.gmra.mxu0 %vm202_vm1, %v3459_v17 }
  0xd8   : > { %4537 = vst [vmem:[#allocation25_spill] sm:$0xff] %v3863_v35 }
  0xda   : > { %2965 = vmatmul.msk.f32.gmra.mxu1 %vm202_vm1, %v3827_v23  ;;  %v3886_v23 = vld [vmem:[#allocation2 + $0xc2] sm:$0xff] }
  0xdb   : > { %2999 = vmatmul.msk.f32.gmra.mxu2 %vm202_vm1, %v3867_v41  ;;  %v293_v41 = vld [vmem:[#allocation2 + $0xff] sm:$0x1] }
  0xdc   : > { %3033 = vmatmul.msk.f32.gmra.mxu3 %vm202_vm1, %v3869_v59  ;;  %v3877_v21 = vpop.f32.mrf.mxu0  ;;  %311 = vst.msk [vmem:[#allocation2 + $0x101] sm:$0x1] %vm264_vm2, %v293_v41 }
  0xde   : > { %v3880_v35 = vpop.f32.mrf.mxu2 }
  0xdf   : > { %4540 = vst [vmem:[#allocation28_spill] sm:$0xff] %v3880_v35  ;;  %v3882_v17 = vpop.f32.mrf.mxu3  ;;  %v715_v12 = vpop.f32.mrf.mxu1  ;;  %3067 = vmatmul.msk.f32.gmra.mxu0 %vm202_vm1, %v3482_v27 }
  0xe0   : > { %4541 = vst [vmem:[#allocation29_spill] sm:$0xff] %v3882_v17  ;;  %v716_v17 = vadd.f32 %v715_v12, %v3731_v57  ;;  %v258_v12 = vld [vmem:[#allocation2 + $0x122] sm:$0x1] }
  0xe1   : > { %277 = vst.msk [vmem:[#allocation2 + $0x120] sm:$0x1] %vm264_vm2, %v258_v12 }
  0xe2   : > { %2966 = vmatmul.msk.f32.gmra.mxu1 %vm202_vm1, %v3848_v13  ;;  %v3900_v13 = vld [vmem:[#allocation2 + $0xca] sm:$0xff] }
  0xe3   : > { %3000 = vmatmul.msk.f32.gmra.mxu2 %vm202_vm1, %v3886_v23  ;;  %4542 = vst [vmem:[#allocation30_spill] sm:$0xff] %v3900_v13 }
  0xe4   : > { %3034 = vmatmul.msk.f32.gmra.mxu3 %vm202_vm1, %v3888_v20  ;;  %v1517_v7 = vpop.f32.mrf.mxu0 }
  0xe6   : > { %v961_v27 = vpop.f32.mrf.mxu2 }
  0xe7   : > { %v1057_v35 = vadd.f32 %v961_v27, %v716_v17  ;;  %v718_v0 = vpop.f32.mrf.mxu1  ;;  %v1239_v11 = vpop.f32.mrf.mxu3  ;;  %3068 = vmatmul.msk.f32.gmra.mxu0 %vm202_vm1, %v3510_v38 }
  0xe8   : > { %v719_v38 = vadd.f32 %v718_v0, %v3751_v1 }
  0xe9   : > { %v1335_v18 = vadd.f32 %v1239_v11, %v1057_v35 }
  0xea   : > { %2967 = vmatmul.msk.f32.gmra.mxu1 %vm202_vm1, %v3869_v59 }
  0xeb   : > { %v3906_v41 = vadd.f32 %v1517_v7, %v1335_v18  ;;  %3001 = vmatmul.msk.f32.gmra.mxu2 %vm202_vm1, %v3900_v13  ;;  %v3916_v18 = vld [vmem:[#allocation2 + $0xda] sm:$0xff]  ;;  %v294_v13 = vld [vmem:[#allocation2 + $0x117] sm:$0x1] }
  0xec   : > { %3035 = vmatmul.msk.f32.gmra.mxu3 %vm202_vm1, %v3902_v52  ;;  %v1520_v57 = vpop.f32.mrf.mxu0  ;;  %312 = vst.msk [vmem:[#allocation2 + $0x119] sm:$0x1] %vm264_vm2, %v294_v13 }
  0xed   : > { %4543 = vst [vmem:[#allocation31_spill] sm:$0xff] %v3906_v41  ;;  %v3918_v41 = vld [vmem:[#allocation2 + $0xf0] sm:$0xff] }
  0xee   : > { %v964_v11 = vpop.f32.mrf.mxu2 }
  0xef   : > { %v1058_v35 = vadd.f32 %v964_v11, %v719_v38  ;;  %v721_v17 = vpop.f32.mrf.mxu1  ;;  %v1242_v27 = vpop.f32.mrf.mxu3  ;;  %3069 = vmatmul.msk.f32.gmra.mxu0 %vm202_vm1, %v3539_v47 }
  0xf0   : > { %v722_v0 = vadd.f32 %v721_v17, %v3773_v14  ;;  %v259_v17 = vld [vmem:[#allocation2 + $0x13a] sm:$0x1] }
  0xf1   : > { %v1336_v7 = vadd.f32 %v1242_v27, %v1058_v35  ;;  %v1108_v27 = vld [vmem:[#allocation2 + $0xf8] sm:$0xff]  ;;  %278 = vst.msk [vmem:[#allocation2 + $0x138] sm:$0x1] %vm264_vm2, %v259_v17 }
  0xf2   : > { %2968 = vmatmul.msk.f32.gmra.mxu1 %vm202_vm1, %v3888_v20 }
  0xf3   : > { %v3922_v59 = vadd.f32 %v1520_v57, %v1336_v7  ;;  %3002 = vmatmul.msk.f32.gmra.mxu2 %vm202_vm1, %v3916_v18  ;;  %v3932_v57 = vld [vmem:[#allocation2 + $0xe2] sm:$0xff] }
  0xf4   : > { %3036 = vmatmul.msk.f32.gmra.mxu3 %vm202_vm1, %v3918_v41  ;;  %v1523_v47 = vpop.f32.mrf.mxu0 }
  0xf5   : > { %4544 = vst [vmem:[#allocation32_spill] sm:$0xff] %v3922_v59 }
  0xf6   : > { %v967_v1 = vpop.f32.mrf.mxu2 }
  0xf7   : > { %v1059_v12 = vadd.f32 %v967_v1, %v722_v0  ;;  %v724_v38 = vpop.f32.mrf.mxu1  ;;  %v1245_v11 = vpop.f32.mrf.mxu3  ;;  %3070 = vmatmul.msk.f32.gmra.mxu0 %vm202_vm1, %v3560_v54 }
  0xf8   : > { %v725_v7 = vadd.f32 %v724_v38, %v3793_v22 }
  0xf9   : > { %v1337_v35 = vadd.f32 %v1245_v11, %v1059_v12 }
  0xfa   : > { %2969 = vmatmul.msk.f32.gmra.mxu1 %vm202_vm1, %v3902_v52 }
  0xfb   : > { %v3936_v13 = vadd.f32 %v1523_v47, %v1337_v35  ;;  %3003 = vmatmul.msk.f32.gmra.mxu2 %vm202_vm1, %v3932_v57  ;;  %v3945_v47 = vld [vmem:[#allocation2 + $0xf2] sm:$0xff]  ;;  %v1109_v35 = vld [vmem:[#allocation2 + $0x108] sm:$0xff] }
  0xfc   : > { %3037 = vmatmul.msk.f32.gmra.mxu3 %vm202_vm1, %v1108_v27  ;;  %v1526_v14 = vpop.f32.mrf.mxu0 }
  0xfd   : > { %4545 = vst [vmem:[#allocation33_spill] sm:$0xff] %v3936_v13  ;;  %v295_v13 = vld [vmem:[#allocation2 + $0x12f] sm:$0x1] }
  0xfe   : > { %v970_v54 = vpop.f32.mrf.mxu2  ;;  %313 = vst.msk [vmem:[#allocation2 + $0x131] sm:$0x1] %vm264_vm2, %v295_v13  ;;  %v260_v13 = vld [vmem:[#allocation2 + $0x152] sm:$0x1] }
  0xff   : > { %v1060_v0 = vadd.f32 %v970_v54, %v725_v7  ;;  %v727_v1 = vpop.f32.mrf.mxu1  ;;  %v1248_v12 = vpop.f32.mrf.mxu3  ;;  %3071 = vmatmul.msk.f32.gmra.mxu0 %vm202_vm1, %v3589_v62  ;;  %279 = vst.msk [vmem:[#allocation2 + $0x150] sm:$0x1] %vm264_vm2, %v260_v13 }
 0x100   : > { %v728_v62 = vadd.f32 %v727_v1, %v3815_v50 }
 0x101   : > { %v1338_v11 = vadd.f32 %v1248_v12, %v1060_v0  ;;  %v3958_v0 = vld [vmem:[#allocation2 + $0xfa] sm:$0xff]  ;;  %v1110_v12 = vld [vmem:[#allocation2 + $0x110] sm:$0xff] }
 0x102   : > { %2970 = vmatmul.msk.f32.gmra.mxu1 %vm202_vm1, %v3918_v41 }
 0x103   : > { %v3949_v59 = vadd.f32 %v1526_v14, %v1338_v11  ;;  %3004 = vmatmul.msk.f32.gmra.mxu2 %vm202_vm1, %v3945_v47 }
 0x104   : > { %3038 = vmatmul.msk.f32.gmra.mxu3 %vm202_vm1, %v1109_v35  ;;  %v1529_v22 = vpop.f32.mrf.mxu0 }
 0x106   : > { %v973_v38 = vpop.f32.mrf.mxu2 }
 0x107   : > { %v1061_v17 = vadd.f32 %v973_v38, %v728_v62  ;;  %v730_v7 = vpop.f32.mrf.mxu1  ;;  %v1251_v54 = vpop.f32.mrf.mxu3  ;;  %3072 = vmatmul.msk.f32.gmra.mxu0 %vm202_vm1, %v3607_v4 }
 0x108   : > { %v731_v1 = vadd.f32 %v730_v7, %v3835_v44 }
 0x109   : > { %v1339_v14 = vadd.f32 %v1251_v54, %v1061_v17  ;;  %v1111_v54 = vld [vmem:[#allocation2 + $0x120] sm:$0xff] }
 0x10a   : > { %2971 = vmatmul.msk.f32.gmra.mxu1 %vm202_vm1, %v1108_v27  ;;  %v3970_v27 = vld [vmem:[#allocation2 + $0x10a] sm:$0xff] }
 0x10b   : > { %v3961_v11 = vadd.f32 %v1529_v22, %v1339_v14  ;;  %3005 = vmatmul.msk.f32.gmra.mxu2 %vm202_vm1, %v3958_v0  ;;  %v296_v14 = vld [vmem:[#allocation2 + $0x147] sm:$0x1] }
 0x10c   : > { %3039 = vmatmul.msk.f32.gmra.mxu3 %vm202_vm1, %v1110_v12  ;;  %v1532_v50 = vpop.f32.mrf.mxu0  ;;  %314 = vst.msk [vmem:[#allocation2 + $0x149] sm:$0x1] %vm264_vm2, %v296_v14 }
 0x10d   : > { %4546 = vst [vmem:[#allocation34_spill] sm:$0xff] %v3961_v11 }
 0x10e   : > { %v976_v4 = vpop.f32.mrf.mxu2 }
 0x10f   : > { %v1062_v62 = vadd.f32 %v976_v4, %v731_v1  ;;  %v733_v38 = vpop.f32.mrf.mxu1  ;;  %v1254_v17 = vpop.f32.mrf.mxu3  ;;  %3073 = vmatmul.msk.f32.gmra.mxu0 %vm202_vm1, %v3621_v9 }
 0x110   : > { %v734_v7 = vadd.f32 %v733_v38, %v3857_v32  ;;  %v261_v38 = vld [vmem:[#allocation2 + $0x16a] sm:$0x1] }
 0x111   : > { %v1340_v22 = vadd.f32 %v1254_v17, %v1062_v62  ;;  %v1112_v62 = vld [vmem:[#allocation2 + $0x128] sm:$0xff]  ;;  %280 = vst.msk [vmem:[#allocation2 + $0x168] sm:$0x1] %vm264_vm2, %v261_v38 }
 0x112   : > { %2972 = vmatmul.msk.f32.gmra.mxu1 %vm202_vm1, %v1109_v35  ;;  %v3982_v35 = vld [vmem:[#allocation2 + $0x112] sm:$0xff] }
 0x113   : > { %v3973_v11 = vadd.f32 %v1532_v50, %v1340_v22  ;;  %3006 = vmatmul.msk.f32.gmra.mxu2 %vm202_vm1, %v3970_v27 }
 0x114   : > { %3040 = vmatmul.msk.f32.gmra.mxu3 %vm202_vm1, %v1111_v54  ;;  %v1535_v44 = vpop.f32.mrf.mxu0 }
 0x116   : > { %v979_v9 = vpop.f32.mrf.mxu2 }
 0x117   : > { %v1063_v13 = vadd.f32 %v979_v9, %v734_v7  ;;  %v736_v1 = vpop.f32.mrf.mxu1  ;;  %v1257_v4 = vpop.f32.mrf.mxu3  ;;  %3074 = vmatmul.msk.f32.gmra.mxu0 %vm202_vm1, %v3465_v19 }
 0x118   : > { %v737_v22 = vadd.f32 %v736_v1, %v3877_v21  ;;  %v199_v1 = vld [vmem:[%s3433_s11 + $0xf0] sm:$0xff] }
 0x119   : > { %v1341_v50 = vadd.f32 %v1257_v4, %v1063_v13  ;;  %v1113_v13 = vld [vmem:[#allocation2 + $0x138] sm:$0xff]  ;;  %233 = vst.msk [vmem:[#allocation2 + $0x181] sm:$0xff] %vm202_vm1, %v199_v1 }
 0x11a   : > { %2973 = vmatmul.msk.f32.gmra.mxu1 %vm202_vm1, %v1110_v12  ;;  %v3994_v12 = vld [vmem:[#allocation2 + $0x122] sm:$0xff]  ;;  %v297_v4 = vld [vmem:[#allocation2 + $0x15f] sm:$0x1] }
 0x11b   : > { %v3985_v17 = vadd.f32 %v1535_v44, %v1341_v50  ;;  %3007 = vmatmul.msk.f32.gmra.mxu2 %vm202_vm1, %v3982_v35  ;;  %315 = vst.msk [vmem:[#allocation2 + $0x161] sm:$0x1] %vm264_vm2, %v297_v4 }
 0x11c   : > { %3041 = vmatmul.msk.f32.gmra.mxu3 %vm202_vm1, %v1112_v62  ;;  %v1538_v32 = vpop.f32.mrf.mxu0 }
 0x11e   : > { %v982_v19 = vpop.f32.mrf.mxu2 }
 0x11f   : > { %v1064_v14 = vadd.f32 %v982_v19, %v737_v22  ;;  %v739_v7 = vpop.f32.mrf.mxu1  ;;  %v1260_v9 = vpop.f32.mrf.mxu3  ;;  %3075 = vmatmul.msk.f32.gmra.mxu0 %vm202_vm1, %v3486_v29 }
 0x120   : > { %v740_v29 = vadd.f32 %v739_v7, %v3716_v51  ;;  %v262_v7 = vld [vmem:[#allocation2 + $0x182] sm:$0x1] }
 0x121   : > { %v1342_v44 = vadd.f32 %v1260_v9, %v1064_v14  ;;  %v1114_v9 = vld [vmem:[#allocation2 + $0x140] sm:$0xff]  ;;  %281 = vst.msk [vmem:[#allocation2 + $0x180] sm:$0x1] %vm264_vm2, %v262_v7 }
 0x122   : > { %2974 = vmatmul.msk.f32.gmra.mxu1 %vm202_vm1, %v1111_v54 }
 0x123   : > { %v3997_v50 = vadd.f32 %v1538_v32, %v1342_v44  ;;  %3008 = vmatmul.msk.f32.gmra.mxu2 %vm202_vm1, %v3994_v12  ;;  %v4008_v32 = vld [vmem:[#allocation2 + $0x12a] sm:$0xff] }
 0x124   : > { %3042 = vmatmul.msk.f32.gmra.mxu3 %vm202_vm1, %v1113_v13  ;;  %v1541_v21 = vpop.f32.mrf.mxu0 }
 0x126   : > { %v985_v38 = vpop.f32.mrf.mxu2 }
 0x127   : > { %v1065_v22 = vadd.f32 %v985_v38, %v740_v29  ;;  %v742_v19 = vpop.f32.mrf.mxu1  ;;  %v1263_v54 = vpop.f32.mrf.mxu3  ;;  %3076 = vmatmul.msk.f32.gmra.mxu0 %vm202_vm1, %v3513_v39 }
 0x128   : > { %v743_v4 = vadd.f32 %v742_v19, %v3735_v25  ;;  %v200_v19 = vld [vmem:[%s3433_s11 + $0xf8] sm:$0xff] }
 0x129   : > { %v1343_v14 = vadd.f32 %v1263_v54, %v1065_v22  ;;  %v1115_v22 = vld [vmem:[#allocation2 + $0x150] sm:$0xff]  ;;  %234 = vst.msk [vmem:[#allocation2 + $0x189] sm:$0xff] %vm202_vm1, %v200_v19 }
 0x12a   : > { %2975 = vmatmul.msk.f32.gmra.mxu1 %vm202_vm1, %v1112_v62  ;;  %v4020_v62 = vld [vmem:[#allocation2 + $0x13a] sm:$0xff]  ;;  %v298_v54 = vld [vmem:[#allocation2 + $0x177] sm:$0x1] }
 0x12b   : > { %v4011_v44 = vadd.f32 %v1541_v21, %v1343_v14  ;;  %3009 = vmatmul.msk.f32.gmra.mxu2 %vm202_vm1, %v4008_v32  ;;  %316 = vst.msk [vmem:[#allocation2 + $0x179] sm:$0x1] %vm264_vm2, %v298_v54 }
 0x12c   : > { %3043 = vmatmul.msk.f32.gmra.mxu3 %vm202_vm1, %v1114_v9  ;;  %v1544_v51 = vpop.f32.mrf.mxu0 }
 0x12e   : > { %v988_v39 = vpop.f32.mrf.mxu2 }
 0x12f   : > { %v1066_v1 = vadd.f32 %v988_v39, %v743_v4  ;;  %v745_v29 = vpop.f32.mrf.mxu1  ;;  %v1266_v38 = vpop.f32.mrf.mxu3  ;;  %3077 = vmatmul.msk.f32.gmra.mxu0 %vm202_vm1, %v3542_v48 }
 0x130   : > { %v746_v48 = vadd.f32 %v745_v29, %v3756_v36 }
 0x131   : > { %v1344_v21 = vadd.f32 %v1266_v38, %v1066_v1  ;;  %v1116_v38 = vld [vmem:[#allocation2 + $0x158] sm:$0xff] }
 0x132   : > { %2976 = vmatmul.msk.f32.gmra.mxu1 %vm202_vm1, %v1113_v13 }
 0x133   : > { %v4023_v14 = vadd.f32 %v1544_v51, %v1344_v21  ;;  %3010 = vmatmul.msk.f32.gmra.mxu2 %vm202_vm1, %v4020_v62  ;;  %v4034_v51 = vld [vmem:[#allocation2 + $0x142] sm:$0xff] }
 0x134   : > { %3044 = vmatmul.msk.f32.gmra.mxu3 %vm202_vm1, %v1115_v22  ;;  %v1547_v25 = vpop.f32.mrf.mxu0 }
 0x136   : > { %v991_v7 = vpop.f32.mrf.mxu2 }
 0x137   : > { %v1067_v4 = vadd.f32 %v991_v7, %v746_v48  ;;  %v748_v39 = vpop.f32.mrf.mxu1  ;;  %v1269_v13 = vpop.f32.mrf.mxu3  ;;  %3078 = vmatmul.msk.f32.gmra.mxu0 %vm202_vm1, %v3562_v55  ;;  %v4045_v7 = vld [vmem:[#allocation2 + $0x152] sm:$0xff] }
 0x138   : > { %v749_v29 = vadd.f32 %v748_v39, %v3777_v46 }
 0x139   : > { %v1345_v1 = vadd.f32 %v1269_v13, %v1067_v4 }
 0x13a   : > { %2977 = vmatmul.msk.f32.gmra.mxu1 %vm202_vm1, %v1114_v9 }
 0x13b   : > { %v4037_v21 = vadd.f32 %v1547_v25, %v1345_v1  ;;  %3011 = vmatmul.msk.f32.gmra.mxu2 %vm202_vm1, %v4034_v51  ;;  %v1117_v25 = vld [vmem:[#allocation2 + $0x168] sm:$0xff] }
 0x13c   : > { %3045 = vmatmul.msk.f32.gmra.mxu3 %vm202_vm1, %v1116_v38  ;;  %v1550_v36 = vpop.f32.mrf.mxu0 }
 0x13e   : > { %v994_v54 = vpop.f32.mrf.mxu2 }
 0x13f   : > { %v1068_v19 = vadd.f32 %v994_v54, %v749_v29  ;;  %v751_v48 = vpop.f32.mrf.mxu1  ;;  %v1272_v55 = vpop.f32.mrf.mxu3  ;;  %3079 = vmatmul.msk.f32.gmra.mxu0 %vm202_vm1, %v3591_v63  ;;  %v4056_v54 = vld [vmem:[#allocation2 + $0x15a] sm:$0xff] }
 0x140   : > { %v752_v39 = vadd.f32 %v751_v48, %v3798_v53 }
 0x141   : > { %v1346_v9 = vadd.f32 %v1272_v55, %v1068_v19 }
 0x142   : > { %2978 = vmatmul.msk.f32.gmra.mxu1 %vm202_vm1, %v1115_v22 }
 0x143   : > { %v4048_v4 = vadd.f32 %v1550_v36, %v1346_v9  ;;  %3012 = vmatmul.msk.f32.gmra.mxu2 %vm202_vm1, %v4045_v7  ;;  %v1118_v36 = vld [vmem:[#allocation2 + $0x170] sm:$0xff] }
 0x144   : > { %3046 = vmatmul.msk.f32.gmra.mxu3 %vm202_vm1, %v1117_v25  ;;  %v1553_v46 = vpop.f32.mrf.mxu0 }
 0x146   : > { %v997_v13 = vpop.f32.mrf.mxu2 }
 0x147   : > { %v1069_v1 = vadd.f32 %v997_v13, %v752_v39  ;;  %v754_v29 = vpop.f32.mrf.mxu1  ;;  %v1275_v63 = vpop.f32.mrf.mxu3  ;;  %3080 = vmatmul.msk.f32.gmra.mxu0 %vm202_vm1, %v3609_v5  ;;  %v4067_v13 = vld [vmem:[#allocation2 + $0x16a] sm:$0xff] }
 0x148   : > { %v755_v48 = vadd.f32 %v754_v29, %v3819_v61  ;;  %v4078_v29 = vld [vmem:[#allocation2 + $0x181] sm:$0xff] }
 0x149   : > { %v1347_v22 = vadd.f32 %v1275_v63, %v1069_v1 }
 0x14a   : > { %2979 = vmatmul.msk.f32.gmra.mxu1 %vm202_vm1, %v1116_v38 }
 0x14b   : > { %v4059_v19 = vadd.f32 %v1553_v46, %v1347_v22  ;;  %3013 = vmatmul.msk.f32.gmra.mxu2 %vm202_vm1, %v4056_v54  ;;  %v4069_v46 = vld [vmem:[#allocation2 + $0x180] sm:$0xff] }
 0x14c   : > { %3047 = vmatmul.msk.f32.gmra.mxu3 %vm202_vm1, %v1118_v36  ;;  %v1556_v53 = vpop.f32.mrf.mxu0 }
 0x14e   : > { %v1000_v55 = vpop.f32.mrf.mxu2 }
 0x14f   : > { %v1070_v9 = vadd.f32 %v1000_v55, %v755_v48  ;;  %v757_v39 = vpop.f32.mrf.mxu1  ;;  %v1278_v5 = vpop.f32.mrf.mxu3  ;;  %3081 = vmatmul.msk.f32.gmra.mxu0 %vm202_vm1, %v3623_v10 }
 0x150   : > { %v758_v10 = vadd.f32 %v757_v39, %v3840_v3  ;;  %v4094_v39 = vld [vmem:[#allocation2 + $0x189] sm:$0xff] }
 0x151   : > { %v1348_v38 = vadd.f32 %v1278_v5, %v1070_v9  ;;  %v4085_v9 = vld [vmem:[#allocation2 + $0x188] sm:$0xff] }
 0x152   : > { %2980 = vmatmul.msk.f32.gmra.mxu1 %vm202_vm1, %v1117_v25  ;;  %v4083_v25 = vld [vmem:[#allocation2 + $0x172] sm:$0xff] }
 0x153   : > { %v4072_v1 = vadd.f32 %v1556_v53, %v1348_v38  ;;  %3014 = vmatmul.msk.f32.gmra.mxu2 %vm202_vm1, %v4067_v13 }
 0x154   : > { %3048 = vmatmul.msk.f32.gmra.mxu3 %vm202_vm1, %v4069_v46  ;;  %v1559_v61 = vpop.f32.mrf.mxu0 }
 0x155   : > { %4547 = vst [vmem:[#allocation35_spill] sm:$0xff] %v4072_v1 }
 0x156   : > { %v1003_v63 = vpop.f32.mrf.mxu2 }
 0x157   : > { %v1071_v22 = vadd.f32 %v1003_v63, %v758_v10  ;;  %v760_v48 = vpop.f32.mrf.mxu1  ;;  %v1281_v55 = vpop.f32.mrf.mxu3  ;;  %3082 = vmatmul.msk.f32.gmra.mxu0 %vm202_vm1, %v4078_v29 }
 0x158   : > { %v761_v38 = vadd.f32 %v760_v48, %v3861_v8 }
 0x159   : > { %v1349_v53 = vadd.f32 %v1281_v55, %v1071_v22 }
 0x15a   : > { %2981 = vmatmul.msk.f32.gmra.mxu1 %vm202_vm1, %v1118_v36 }
 0x15b   : > { %v4088_v5 = vadd.f32 %v1559_v61, %v1349_v53  ;;  %3015 = vmatmul.msk.f32.gmra.mxu2 %vm202_vm1, %v4083_v25  ;;  %v2202_v61 = vld [vmem:[#allocation2 + $0x31] sm:$0xff] }
 0x15c   : > { %3049 = vmatmul.msk.f32.gmra.mxu3 %vm202_vm1, %v4085_v9  ;;  %v1562_v3 = vpop.f32.mrf.mxu0 }
 0x15d   : > { %4548 = vst [vmem:[#allocation36_spill] sm:$0xff] %v4088_v5 }
 0x15e   : > { %v1006_v10 = vpop.f32.mrf.mxu2 }
 0x15f   : > { %v1072_v63 = vadd.f32 %v1006_v10, %v761_v38  ;;  %v763_v22 = vpop.f32.mrf.mxu1  ;;  %v1284_v55 = vpop.f32.mrf.mxu3  ;;  %3083 = vmatmul.msk.f32.gmra.mxu0 %vm202_vm1, %v4094_v39 }
 0x160   : > { %v764_v48 = vadd.f32 %v763_v22, %v3733_v58 }
 0x161   : > { %v1350_v36 = vadd.f32 %v1284_v55, %v1072_v63  ;;  %v2203_v55 = vld [vmem:[#allocation2 + $0x39] sm:$0xff] }
 0x162   : > { %3086 = vmatmul.msk.f32.vlgmr.msra.gmra.mxu1 %vm202_vm1, %v3645_v24 }
 0x163   : > { %v4101_v53 = vadd.f32 %v1562_v3, %v1350_v36  ;;  %3120 = vmatmul.msk.f32.vlgmr.msra.gmra.mxu2 %vm202_vm1, %v3647_v26 }
 0x164   : > { %3154 = vmatmul.msk.f32.vlgmr.msra.gmra.mxu3 %vm202_vm1, %v2202_v61  ;;  %v1565_v8 = vpop.f32.mrf.mxu0 }
 0x166   : > { %v1009_v38 = vpop.f32.mrf.mxu2 }
 0x167   : > { %v1073_v10 = vadd.f32 %v1009_v38, %v764_v48  ;;  %v766_v5 = vpop.f32.mrf.mxu1  ;;  %v1287_v1 = vpop.f32.mrf.mxu3  ;;  %3188 = vmatmul.msk.f32.vlgmr.msra.gmra.mxu0 %vm202_vm1, %v3668_v33  ;;  %v2204_v48 = vld [vmem:[#allocation2 + $0x49] sm:$0xff] }
 0x168   : > { %v767_v58 = vadd.f32 %v766_v5, %v3754_v6 }
 0x169   : > { %v1351_v63 = vadd.f32 %v1287_v1, %v1073_v10 }
 0x16a   : > { %3087 = vmatmul.msk.f32.gmra.mxu1 %vm202_vm1, %v3657_v30 }
 0x16b   : > { %v4111_v24 = vadd.f32 %v1565_v8, %v1351_v63  ;;  %3121 = vmatmul.msk.f32.gmra.mxu2 %vm202_vm1, %v3659_v31 }
 0x16c   : > { %3155 = vmatmul.msk.f32.gmra.mxu3 %vm202_vm1, %v2203_v55  ;;  %v1568_v26 = vpop.f32.mrf.mxu0  ;;  %v2205_v55 = vld [vmem:[#allocation2 + $0x51] sm:$0xff] }
 0x16e   : > { %v1012_v3 = vpop.f32.mrf.mxu2 }
 0x16f   : > { %v1074_v22 = vadd.f32 %v1012_v3, %v767_v58  ;;  %v769_v36 = vpop.f32.mrf.mxu1  ;;  %v1290_v61 = vpop.f32.mrf.mxu3  ;;  %3189 = vmatmul.msk.f32.gmra.mxu0 %vm202_vm1, %v3680_v37 }
 0x170   : > { %v770_v6 = vadd.f32 %v769_v36, %v3775_v16 }
 0x171   : > { %v1352_v1 = vadd.f32 %v1290_v61, %v1074_v22  ;;  %v2206_v61 = vld [vmem:[#allocation2 + $0x61] sm:$0xff] }
 0x172   : > { %3088 = vmatmul.msk.f32.gmra.mxu1 %vm202_vm1, %v3668_v33 }
 0x173   : > { %v4121_v30 = vadd.f32 %v1568_v26, %v1352_v1  ;;  %3122 = vmatmul.msk.f32.gmra.mxu2 %vm202_vm1, %v3670_v34 }
 0x174   : > { %3156 = vmatmul.msk.f32.gmra.mxu3 %vm202_vm1, %v2204_v48  ;;  %v1571_v31 = vpop.f32.mrf.mxu0 }
 0x176   : > { %v1015_v5 = vpop.f32.mrf.mxu2 }
 0x177   : > { %v1075_v8 = vadd.f32 %v1015_v5, %v770_v6  ;;  %v772_v38 = vpop.f32.mrf.mxu1  ;;  %v1293_v10 = vpop.f32.mrf.mxu3  ;;  %3190 = vmatmul.msk.f32.gmra.mxu0 %vm202_vm1, %v3692_v42 }
 0x178   : > { %v773_v16 = vadd.f32 %v772_v38, %v3796_v28 }
 0x179   : > { %v1353_v63 = vadd.f32 %v1293_v10, %v1075_v8  ;;  %v2207_v8 = vld [vmem:[#allocation2 + $0x69] sm:$0xff] }
 0x17a   : > { %3089 = vmatmul.msk.f32.gmra.mxu1 %vm202_vm1, %v3680_v37 }
 0x17b   : > { %v4131_v33 = vadd.f32 %v1571_v31, %v1353_v63  ;;  %3123 = vmatmul.msk.f32.gmra.mxu2 %vm202_vm1, %v3682_v40 }
 0x17c   : > { %3157 = vmatmul.msk.f32.gmra.mxu3 %vm202_vm1, %v2205_v55  ;;  %v1574_v34 = vpop.f32.mrf.mxu0 }
 0x17e   : > { %v1018_v26 = vpop.f32.mrf.mxu2 }
 0x17f   : > { %v1076_v58 = vadd.f32 %v1018_v26, %v773_v16  ;;  %v775_v3 = vpop.f32.mrf.mxu1  ;;  %v1296_v22 = vpop.f32.mrf.mxu3  ;;  %3191 = vmatmul.msk.f32.gmra.mxu0 %vm202_vm1, %v3705_v45  ;;  %v2208_v16 = vld [vmem:[#allocation2 + $0x79] sm:$0xff] }
 0x180   : > { %v776_v28 = vadd.f32 %v775_v3, %v3817_v56  ;;  %v4550_v26 = vld [vmem:[#allocation24_spill] sm:$0xff] }
 0x181   : > { %v1354_v36 = vadd.f32 %v1296_v22, %v1076_v58 }
 0x182   : > { %3090 = vmatmul.msk.f32.gmra.mxu1 %vm202_vm1, %v3692_v42 }
 0x183   : > { %v4141_v37 = vadd.f32 %v1574_v34, %v1354_v36  ;;  %3124 = vmatmul.msk.f32.gmra.mxu2 %vm202_vm1, %v3694_v43 }
 0x184   : > { %3158 = vmatmul.msk.f32.gmra.mxu3 %vm202_vm1, %v2206_v61  ;;  %v1577_v40 = vpop.f32.mrf.mxu0 }
 0x186   : > { %v1021_v1 = vpop.f32.mrf.mxu2 }
 0x187   : > { %v1077_v48 = vadd.f32 %v1021_v1, %v776_v28  ;;  %v778_v31 = vpop.f32.mrf.mxu1  ;;  %v1299_v6 = vpop.f32.mrf.mxu3  ;;  %3192 = vmatmul.msk.f32.gmra.mxu0 %vm202_vm1, %v3720_v15  ;;  %v2209_v1 = vld [vmem:[#allocation2 + $0x81] sm:$0xff] }
 0x188   : > { %v779_v56 = vadd.f32 %v778_v31, %v3838_v2 }
 0x189   : > { %v1355_v5 = vadd.f32 %v1299_v6, %v1077_v48  ;;  %v4552_v48 = vld [vmem:[#allocation8_spill] sm:$0xff] }
 0x18a   : > { %3091 = vmatmul.msk.f32.gmra.mxu1 %vm202_vm1, %v3705_v45  ;;  %v4553_v6 = vld [vmem:[#allocation28_spill] sm:$0xff] }
 0x18b   : > { %v4151_v42 = vadd.f32 %v1577_v40, %v1355_v5  ;;  %3125 = vmatmul.msk.f32.gmra.mxu2 %vm202_vm1, %v3707_v49  ;;  %v4549_v49 = vld [vmem:[#allocation6_spill] sm:$0xff] }
 0x18c   : > { %3159 = vmatmul.msk.f32.gmra.mxu3 %vm202_vm1, %v2207_v8  ;;  %v1580_v43 = vpop.f32.mrf.mxu0  ;;  %v4551_v40 = vld [vmem:[#allocation10_spill] sm:$0xff] }
 0x18e   : > { %v1024_v38 = vpop.f32.mrf.mxu2 }
 0x18f   : > { %v1078_v10 = vadd.f32 %v1024_v38, %v779_v56  ;;  %v781_v63 = vpop.f32.mrf.mxu1  ;;  %v1302_v55 = vpop.f32.mrf.mxu3  ;;  %3193 = vmatmul.msk.f32.gmra.mxu0 %vm202_vm1, %v3741_v60 }
 0x190   : > { %v782_v58 = vadd.f32 %v781_v63, %v4550_v26 }
 0x191   : > { %v1356_v34 = vadd.f32 %v1302_v55, %v1078_v10  ;;  %v4554_v10 = vld [vmem:[#allocation13_spill] sm:$0xff]  ;;  %v2210_v55 = vld [vmem:[#allocation2 + $0x91] sm:$0xff] }
 0x192   : > { %3092 = vmatmul.msk.f32.gmra.mxu1 %vm202_vm1, %v3720_v15 }
 0x193   : > { %v4161_v45 = vadd.f32 %v1580_v43, %v1356_v34  ;;  %3126 = vmatmul.msk.f32.gmra.mxu2 %vm202_vm1, %v4549_v49  ;;  %v4555_v34 = vld [vmem:[#allocation11_spill] sm:$0xff] }
 0x194   : > { %3160 = vmatmul.msk.f32.gmra.mxu3 %vm202_vm1, %v2208_v16  ;;  %v1583_v2 = vpop.f32.mrf.mxu0  ;;  %v4556_v49 = vld [vmem:[#allocation7_spill] sm:$0xff] }
 0x196   : > { %v1027_v3 = vpop.f32.mrf.mxu2 }
 0x197   : > { %v1079_v22 = vadd.f32 %v1027_v3, %v782_v58  ;;  %v784_v36 = vpop.f32.mrf.mxu1  ;;  %v1305_v61 = vpop.f32.mrf.mxu3  ;;  %3194 = vmatmul.msk.f32.gmra.mxu0 %vm202_vm1, %v4551_v40 }
 0x198   : > { %v785_v5 = vadd.f32 %v784_v36, %v4553_v6  ;;  %v4557_v36 = vld [vmem:[#allocation16_spill] sm:$0xff] }
 0x199   : > { %v1357_v28 = vadd.f32 %v1305_v61, %v1079_v22 }
 0x19a   : > { %3093 = vmatmul.msk.f32.gmra.mxu1 %vm202_vm1, %v3741_v60 }
 0x19b   : > { %v4171_v15 = vadd.f32 %v1583_v2, %v1357_v28  ;;  %3127 = vmatmul.msk.f32.gmra.mxu2 %vm202_vm1, %v4552_v48  ;;  %v2211_v28 = vld [vmem:[#allocation2 + $0x99] sm:$0xff] }
 0x19c   : > { %3161 = vmatmul.msk.f32.gmra.mxu3 %vm202_vm1, %v2209_v1  ;;  %v1586_v31 = vpop.f32.mrf.mxu0  ;;  %v4558_v1 = vld [vmem:[#allocation14_spill] sm:$0xff] }
 0x19e   : > { %v1030_v8 = vpop.f32.mrf.mxu2 }
 0x19f   : > { %v1080_v43 = vadd.f32 %v1030_v8, %v785_v5  ;;  %v787_v56 = vpop.f32.mrf.mxu1  ;;  %v1308_v38 = vpop.f32.mrf.mxu3  ;;  %3195 = vmatmul.msk.f32.gmra.mxu0 %vm202_vm1, %v4554_v10 }
 0x1a0   : > { %v788_v2 = vadd.f32 %v787_v56, %v4556_v49  ;;  %v4562_v49 = vld [vmem:[#allocation12_spill] sm:$0xff] }
 0x1a1   : > { %v1358_v63 = vadd.f32 %v1308_v38, %v1080_v43  ;;  %v4560_v38 = vld [vmem:[#allocation19_spill] sm:$0xff] }
 0x1a2   : > { %3094 = vmatmul.msk.f32.gmra.mxu1 %vm202_vm1, %v4551_v40 }
 0x1a3   : > { %v4181_v60 = vadd.f32 %v1586_v31, %v1358_v63  ;;  %3128 = vmatmul.msk.f32.gmra.mxu2 %vm202_vm1, %v4555_v34  ;;  %v4559_v31 = vld [vmem:[#allocation9_spill] sm:$0xff] }
 0x1a4   : > { %3162 = vmatmul.msk.f32.gmra.mxu3 %vm202_vm1, %v2210_v55  ;;  %v1589_v16 = vpop.f32.mrf.mxu0  ;;  %v2212_v55 = vld [vmem:[#allocation2 + $0xa9] sm:$0xff] }
 0x1a5   : > { %v4561_v34 = vld [vmem:[#allocation17_spill] sm:$0xff] }
 0x1a6   : > { %v1033_v26 = vpop.f32.mrf.mxu2 }
 0x1a7   : > { %v1081_v58 = vadd.f32 %v1033_v26, %v788_v2  ;;  %v790_v3 = vpop.f32.mrf.mxu1  ;;  %v1311_v22 = vpop.f32.mrf.mxu3  ;;  %3196 = vmatmul.msk.f32.gmra.mxu0 %vm202_vm1, %v4557_v36 }
 0x1a8   : > { %v791_v6 = vadd.f32 %v790_v3, %v4559_v31 }
 0x1a9   : > { %v1359_v61 = vadd.f32 %v1311_v22, %v1081_v58 }
 0x1aa   : > { %3095 = vmatmul.msk.f32.gmra.mxu1 %vm202_vm1, %v4554_v10 }
 0x1ab   : > { %v4191_v40 = vadd.f32 %v1589_v16, %v1359_v61  ;;  %3129 = vmatmul.msk.f32.gmra.mxu2 %vm202_vm1, %v4558_v1  ;;  %v4563_v61 = vld [vmem:[#allocation22_spill] sm:$0xff] }
 0x1ac   : > { %3163 = vmatmul.msk.f32.gmra.mxu3 %vm202_vm1, %v2211_v28  ;;  %v1592_v48 = vpop.f32.mrf.mxu0  ;;  %v2213_v1 = vld [vmem:[#allocation2 + $0xb1] sm:$0xff] }
 0x1ae   : > { %v1036_v5 = vpop.f32.mrf.mxu2 }
 0x1af   : > { %v1082_v8 = vadd.f32 %v1036_v5, %v791_v6  ;;  %v793_v43 = vpop.f32.mrf.mxu1  ;;  %v1314_v56 = vpop.f32.mrf.mxu3  ;;  %3197 = vmatmul.msk.f32.gmra.mxu0 %vm202_vm1, %v4560_v38  ;;  %v4565_v6 = vld [vmem:[#allocation15_spill] sm:$0xff] }
 0x1b0   : > { %v794_v2 = vadd.f32 %v793_v43, %v4562_v49  ;;  %v2214_v49 = vld [vmem:[#allocation2 + $0xc1] sm:$0xff] }
 0x1b1   : > { %v1360_v63 = vadd.f32 %v1314_v56, %v1082_v8 }
 0x1b2   : > { %3096 = vmatmul.msk.f32.gmra.mxu1 %vm202_vm1, %v4557_v36 }
 0x1b3   : > { %v4201_v10 = vadd.f32 %v1592_v48, %v1360_v63  ;;  %3130 = vmatmul.msk.f32.gmra.mxu2 %vm202_vm1, %v4561_v34  ;;  %v4564_v48 = vld [vmem:[#allocation20_spill] sm:$0xff] }
 0x1b4   : > { %3164 = vmatmul.msk.f32.gmra.mxu3 %vm202_vm1, %v2212_v55  ;;  %v1595_v16 = vpop.f32.mrf.mxu0  ;;  %v4566_v55 = vld [vmem:[#allocation26_spill] sm:$0xff] }
 0x1b6   : > { %v1039_v26 = vpop.f32.mrf.mxu2 }
 0x1b7   : > { %v1083_v58 = vadd.f32 %v1039_v26, %v794_v2  ;;  %v796_v3 = vpop.f32.mrf.mxu1  ;;  %v1317_v22 = vpop.f32.mrf.mxu3  ;;  %3198 = vmatmul.msk.f32.gmra.mxu0 %vm202_vm1, %v4563_v61  ;;  %v4568_v26 = vld [vmem:[#allocation18_spill] sm:$0xff] }
 0x1b8   : > { %v797_v5 = vadd.f32 %v796_v3, %v4565_v6  ;;  %v2215_v6 = vld [vmem:[#allocation2 + $0xc9] sm:$0xff] }
 0x1b9   : > { %v1361_v28 = vadd.f32 %v1317_v22, %v1083_v58 }
 0x1ba   : > { %3097 = vmatmul.msk.f32.gmra.mxu1 %vm202_vm1, %v4560_v38 }
 0x1bb   : > { %v4211_v36 = vadd.f32 %v1595_v16, %v1361_v28  ;;  %3131 = vmatmul.msk.f32.gmra.mxu2 %vm202_vm1, %v4564_v48  ;;  %v4567_v16 = vld [vmem:[#allocation23_spill] sm:$0xff] }
 0x1bc   : > { %3165 = vmatmul.msk.f32.gmra.mxu3 %vm202_vm1, %v2213_v1  ;;  %v1598_v31 = vpop.f32.mrf.mxu0 }
 0x1be   : > { %v1042_v8 = vpop.f32.mrf.mxu2 }
 0x1bf   : > { %v1084_v43 = vadd.f32 %v1042_v8, %v797_v5  ;;  %v799_v56 = vpop.f32.mrf.mxu1  ;;  %v1320_v63 = vpop.f32.mrf.mxu3  ;;  %3199 = vmatmul.msk.f32.gmra.mxu0 %vm202_vm1, %v4566_v55  ;;  %v4570_v8 = vld [vmem:[#allocation21_spill] sm:$0xff] }
 0x1c0   : > { %v800_v58 = vadd.f32 %v799_v56, %v4568_v26 }
 0x1c1   : > { %v1362_v34 = vadd.f32 %v1320_v63, %v1084_v43 }
 0x1c2   : > { %3098 = vmatmul.msk.f32.gmra.mxu1 %vm202_vm1, %v4563_v61 }
 0x1c3   : > { %v4221_v38 = vadd.f32 %v1598_v31, %v1362_v34  ;;  %3132 = vmatmul.msk.f32.gmra.mxu2 %vm202_vm1, %v4567_v16  ;;  %v4569_v31 = vld [vmem:[#allocation27_spill] sm:$0xff]  ;;  %v4571_v16 = vld [vmem:[#allocation30_spill] sm:$0xff] }
 0x1c4   : > { %3166 = vmatmul.msk.f32.gmra.mxu3 %vm202_vm1, %v2214_v49  ;;  %v1601_v2 = vpop.f32.mrf.mxu0 }
 0x1c6   : > { %v1045_v3 = vpop.f32.mrf.mxu2 }
 0x1c7   : > { %v1085_v22 = vadd.f32 %v1045_v3, %v800_v58  ;;  %v802_v28 = vpop.f32.mrf.mxu1  ;;  %v1323_v1 = vpop.f32.mrf.mxu3  ;;  %3200 = vmatmul.msk.f32.gmra.mxu0 %vm202_vm1, %v3886_v23  ;;  %v1659_v23 = vld [vmem:[#allocation2 + $0xc2] sm:$0xff] }
 0x1c8   : > { %v803_v43 = vadd.f32 %v802_v28, %v4570_v8  ;;  %v4572_v3 = vld [vmem:[#allocation25_spill] sm:$0xff] }
 0x1c9   : > { %v1363_v48 = vadd.f32 %v1323_v1, %v1085_v22  ;;  %v2217_v8 = vld [vmem:[#allocation2 + $0xe1] sm:$0xff] }
 0x1ca   : > { %3099 = vmatmul.msk.f32.gmra.mxu1 %vm202_vm1, %v4566_v55  ;;  %v2216_v55 = vld [vmem:[#allocation2 + $0xd9] sm:$0xff] }
 0x1cb   : > { %v4231_v61 = vadd.f32 %v1601_v2, %v1363_v48  ;;  %3133 = vmatmul.msk.f32.gmra.mxu2 %vm202_vm1, %v4569_v31 }
 0x1cc   : > { %3167 = vmatmul.msk.f32.gmra.mxu3 %vm202_vm1, %v2215_v6  ;;  %v1604_v5 = vpop.f32.mrf.mxu0 }
 0x1ce   : > { %v1048_v56 = vpop.f32.mrf.mxu2 }
 0x1cf   : > { %v1086_v63 = vadd.f32 %v1048_v56, %v803_v43  ;;  %v805_v34 = vpop.f32.mrf.mxu1  ;;  %v1326_v49 = vpop.f32.mrf.mxu3  ;;  %3201 = vmatmul.msk.f32.gmra.mxu0 %vm202_vm1, %v4571_v16  ;;  %v4573_v43 = vld [vmem:[#allocation29_spill] sm:$0xff] }
 0x1d0   : > { %v806_v22 = vadd.f32 %v805_v34, %v4572_v3 }
 0x1d1   : > { %v1364_v26 = vadd.f32 %v1326_v49, %v1086_v63 }
 0x1d2   : > { %3100 = vmatmul.msk.f32.gmra.mxu1 %vm202_vm1, %v1659_v23 }
 0x1d3   : > { %v4240_v2 = vadd.f32 %v1604_v5, %v1364_v26  ;;  %3134 = vmatmul.msk.f32.gmra.mxu2 %vm202_vm1, %v3888_v20 }
 0x1d4   : > { %3168 = vmatmul.msk.f32.gmra.mxu3 %vm202_vm1, %v2216_v55  ;;  %v1607_v58 = vpop.f32.mrf.mxu0 }
 0x1d6   : > { %v1051_v28 = vpop.f32.mrf.mxu2 }
 0x1d7   : > { %v1087_v1 = vadd.f32 %v1051_v28, %v806_v22  ;;  %v808_v48 = vpop.f32.mrf.mxu1  ;;  %v1329_v6 = vpop.f32.mrf.mxu3  ;;  %3202 = vmatmul.msk.f32.gmra.mxu0 %vm202_vm1, %v3916_v18 }
 0x1d8   : > { %v809_v56 = vadd.f32 %v808_v48, %v4573_v43  ;;  %v1662_v48 = vld [vmem:[#allocation2 + $0xe2] sm:$0xff] }
 0x1d9   : > { %v1365_v31 = vadd.f32 %v1329_v6, %v1087_v1  ;;  %v4575_v43 = vld [vmem:[#allocation32_spill] sm:$0xff] }
 0x1da   : > { %3101 = vmatmul.msk.f32.gmra.mxu1 %vm202_vm1, %v4571_v16  ;;  %v2218_v16 = vld [vmem:[#allocation2 + $0xf1] sm:$0xff] }
 0x1db   : > { %v4250_v5 = vadd.f32 %v1607_v58, %v1365_v31  ;;  %3135 = vmatmul.msk.f32.gmra.mxu2 %vm202_vm1, %v3902_v52  ;;  %v4574_v58 = vld [vmem:[#allocation31_spill] sm:$0xff] }
 0x1dc   : > { %3169 = vmatmul.msk.f32.gmra.mxu3 %vm202_vm1, %v2217_v8  ;;  %v1610_v20 = vpop.f32.mrf.mxu0  ;;  %v2219_v31 = vld [vmem:[#allocation2 + $0xf9] sm:$0xff] }
 0x1de   : > { %v1054_v63 = vpop.f32.mrf.mxu2 }
 0x1df   : > { %v1088_v34 = vadd.f32 %v1054_v63, %v809_v56  ;;  %v1332_v49 = vpop.f32.mrf.mxu3  ;;  %v1795_v23 = vpop.f32.mrf.mxu1  ;;  %3203 = vmatmul.msk.f32.gmra.mxu0 %vm202_vm1, %v3932_v57 }
 0x1e0   : > { %v1891_v3 = vadd.f32 %v1795_v23, %v4574_v58  ;;  %v2220_v58 = vld [vmem:[#allocation2 + $0x109] sm:$0xff] }
 0x1e1   : > { %v1366_v26 = vadd.f32 %v1332_v49, %v1088_v34 }
 0x1e2   : > { %3102 = vmatmul.msk.f32.gmra.mxu1 %vm202_vm1, %v3916_v18  ;;  %v1941_v18 = vld [vmem:[#allocation2 + $0xf8] sm:$0xff] }
 0x1e3   : > { %v4260_v52 = vadd.f32 %v1610_v20, %v1366_v26  ;;  %3136 = vmatmul.msk.f32.gmra.mxu2 %vm202_vm1, %v3918_v41  ;;  %v4274_v41 = vld [vmem:[%s4492_s2] ss:$0 sm:$0xff]  ;;  %v1663_v26 = vld [vmem:[#allocation2 + $0xf2] sm:$0xff] }
 0x1e4   : > { %3170 = vmatmul.msk.f32.gmra.mxu3 %vm202_vm1, %v2218_v16  ;;  %v2630_v55 = vpop.f32.mrf.mxu0  ;;  %v1942_v16 = vld [vmem:[#allocation2 + $0x108] sm:$0xff] }
 0x1e6   : > { %v2074_v22 = vpop.f32.mrf.mxu2 }
 0x1e7   : > { %v2170_v28 = vadd.f32 %v2074_v22, %v1891_v3  ;;  %v1798_v57 = vpop.f32.mrf.mxu1  ;;  %v2352_v1 = vpop.f32.mrf.mxu3  ;;  %3204 = vmatmul.msk.f32.gmra.mxu0 %vm202_vm1, %v3945_v47 }
 0x1e8   : > { %v1892_v47 = vadd.f32 %v1798_v57, %v4575_v43  ;;  %v2221_v43 = vld [vmem:[#allocation2 + $0x111] sm:$0xff] }
 0x1e9   : > { %v2448_v6 = vadd.f32 %v2352_v1, %v2170_v28  ;;  %v4576_v28 = vld [vmem:[#allocation33_spill] sm:$0xff] }
 0x1ea   : > { %3103 = vmatmul.msk.f32.gmra.mxu1 %vm202_vm1, %v1662_v48 }
 0x1eb   : > { %v2726_v8 = vadd.f32 %v2630_v55, %v2448_v6  ;;  %3137 = vmatmul.msk.f32.gmra.mxu2 %vm202_vm1, %v1941_v18 }
 0x1ec   : > { %3171 = vmatmul.msk.f32.gmra.mxu3 %vm202_vm1, %v2219_v31  ;;  %v2633_v20 = vpop.f32.mrf.mxu0  ;;  %v1664_v31 = vld [vmem:[#allocation2 + $0xfa] sm:$0xff] }
 0x1ed   : > { %v2762_v56 = vadd.f32 %v4274_v41, %v2726_v8  ;;  %v1943_v8 = vld [vmem:[#allocation2 + $0x110] sm:$0xff] }
 0x1ee   : > { %v2077_v63 = vpop.f32.mrf.mxu2 }
 0x1ef   : > { %2794 = vst [vmem:[%s4281_s6] sm:$0xff] %v2762_v56  ;;  %v2171_v34 = vadd.f32 %v2077_v63, %v1892_v47  ;;  %v1801_v49 = vpop.f32.mrf.mxu1  ;;  %v2355_v23 = vpop.f32.mrf.mxu3  ;;  %3205 = vmatmul.msk.f32.gmra.mxu0 %vm202_vm1, %v3958_v0 }
 0x1f0   : > { %v1893_v57 = vadd.f32 %v1801_v49, %v4576_v28  ;;  %v4577_v28 = vld [vmem:[#allocation34_spill] sm:$0xff] }
 0x1f1   : > { %v2449_v55 = vadd.f32 %v2355_v23, %v2171_v34 }
 0x1f2   : > { %3104 = vmatmul.msk.f32.gmra.mxu1 %vm202_vm1, %v1663_v26 }
 0x1f3   : > { %v2727_v3 = vadd.f32 %v2633_v20, %v2449_v55  ;;  %3138 = vmatmul.msk.f32.gmra.mxu2 %vm202_vm1, %v1942_v16  ;;  %v1665_v16 = vld [vmem:[#allocation2 + $0x10a] sm:$0xff]  ;;  %v1944_v55 = vld [vmem:[#allocation2 + $0x120] sm:$0xff] }
 0x1f4   : > { %3172 = vmatmul.msk.f32.gmra.mxu3 %vm202_vm1, %v2220_v58  ;;  %v2636_v22 = vpop.f32.mrf.mxu0 }
 0x1f5   : > { %v2763_v1 = vadd.f32 %v4274_v41, %v2727_v3  ;;  %v2222_v3 = vld [vmem:[#allocation2 + $0x121] sm:$0xff] }
 0x1f6   : > { %v2080_v48 = vpop.f32.mrf.mxu2 }
 0x1f7   : > { %2795 = vst [vmem:[%s4281_s6 + $0x8] sm:$0xff] %v2763_v1  ;;  %v2172_v18 = vadd.f32 %v2080_v48, %v1893_v57  ;;  %v1804_v0 = vpop.f32.mrf.mxu1  ;;  %v2358_v6 = vpop.f32.mrf.mxu3  ;;  %3206 = vmatmul.msk.f32.gmra.mxu0 %vm202_vm1, %v3970_v27 }
 0x1f8   : > { %v1894_v63 = vadd.f32 %v1804_v0, %v3949_v59 }
 0x1f9   : > { %v2450_v20 = vadd.f32 %v2358_v6, %v2172_v18  ;;  %v1666_v6 = vld [vmem:[#allocation2 + $0x112] sm:$0xff] }
 0x1fa   : > { %3105 = vmatmul.msk.f32.gmra.mxu1 %vm202_vm1, %v1664_v31  ;;  %v1945_v31 = vld [vmem:[#allocation2 + $0x128] sm:$0xff] }
 0x1fb   : > { %v2728_v47 = vadd.f32 %v2636_v22, %v2450_v20  ;;  %3139 = vmatmul.msk.f32.gmra.mxu2 %vm202_vm1, %v1943_v8  ;;  %v2223_v20 = vld [vmem:[#allocation2 + $0x129] sm:$0xff] }
 0x1fc   : > { %3173 = vmatmul.msk.f32.gmra.mxu3 %vm202_vm1, %v2221_v43  ;;  %v2639_v56 = vpop.f32.mrf.mxu0 }
 0x1fd   : > { %v2764_v34 = vadd.f32 %v4274_v41, %v2728_v47 }
 0x1fe   : > { %v2083_v49 = vpop.f32.mrf.mxu2 }
 0x1ff   : > { %2796 = vst [vmem:[%s4281_s6 + $0x10] sm:$0xff] %v2764_v34  ;;  %v2173_v23 = vadd.f32 %v2083_v49, %v1894_v63  ;;  %v1807_v27 = vpop.f32.mrf.mxu1  ;;  %v2361_v26 = vpop.f32.mrf.mxu3  ;;  %3207 = vmatmul.msk.f32.gmra.mxu0 %vm202_vm1, %v3982_v35 }
 0x200   : > { %v1895_v57 = vadd.f32 %v1807_v27, %v4577_v28  ;;  %v1667_v27 = vld [vmem:[#allocation2 + $0x122] sm:$0xff] }
 0x201   : > { %v2451_v58 = vadd.f32 %v2361_v26, %v2173_v23  ;;  %v1946_v26 = vld [vmem:[#allocation2 + $0x138] sm:$0xff] }
 0x202   : > { %3106 = vmatmul.msk.f32.gmra.mxu1 %vm202_vm1, %v1665_v16 }
 0x203   : > { %v2729_v22 = vadd.f32 %v2639_v56, %v2451_v58  ;;  %3140 = vmatmul.msk.f32.gmra.mxu2 %vm202_vm1, %v1944_v55  ;;  %v2224_v55 = vld [vmem:[#allocation2 + $0x139] sm:$0xff] }
 0x204   : > { %3174 = vmatmul.msk.f32.gmra.mxu3 %vm202_vm1, %v2222_v3  ;;  %v2642_v59 = vpop.f32.mrf.mxu0 }
 0x205   : > { %v2765_v1 = vadd.f32 %v4274_v41, %v2729_v22 }
 0x206   : > { %v2086_v48 = vpop.f32.mrf.mxu2 }
 0x207   : > { %2797 = vst [vmem:[%s4281_s6 + $0x18] sm:$0xff] %v2765_v1  ;;  %v2174_v18 = vadd.f32 %v2086_v48, %v1895_v57  ;;  %v1810_v35 = vpop.f32.mrf.mxu1  ;;  %v2364_v0 = vpop.f32.mrf.mxu3  ;;  %3208 = vmatmul.msk.f32.gmra.mxu0 %vm202_vm1, %v3994_v12  ;;  %v1668_v1 = vld [vmem:[#allocation2 + $0x12a] sm:$0xff]  ;;  %v1947_v48 = vld [vmem:[#allocation2 + $0x140] sm:$0xff] }
 0x208   : > { %v1896_v56 = vadd.f32 %v1810_v35, %v3973_v11  ;;  %v2225_v35 = vld [vmem:[#allocation2 + $0x141] sm:$0xff] }
 0x209   : > { %v2452_v8 = vadd.f32 %v2364_v0, %v2174_v18 }
 0x20a   : > { %3107 = vmatmul.msk.f32.gmra.mxu1 %vm202_vm1, %v1666_v6 }
 0x20b   : > { %v2730_v43 = vadd.f32 %v2642_v59, %v2452_v8  ;;  %3141 = vmatmul.msk.f32.gmra.mxu2 %vm202_vm1, %v1945_v31 }
 0x20c   : > { %3175 = vmatmul.msk.f32.gmra.mxu3 %vm202_vm1, %v2223_v20  ;;  %v2645_v47 = vpop.f32.mrf.mxu0 }
 0x20d   : > { %v2766_v63 = vadd.f32 %v4274_v41, %v2730_v43 }
 0x20e   : > { %v2089_v34 = vpop.f32.mrf.mxu2 }
 0x20f   : > { %2798 = vst [vmem:[%s4281_s6 + $0x20] sm:$0xff] %v2766_v63  ;;  %v2175_v49 = vadd.f32 %v2089_v34, %v1896_v56  ;;  %v1813_v12 = vpop.f32.mrf.mxu1  ;;  %v2367_v23 = vpop.f32.mrf.mxu3  ;;  %3209 = vmatmul.msk.f32.gmra.mxu0 %vm202_vm1, %v4008_v32  ;;  %v1948_v56 = vld [vmem:[#allocation2 + $0x150] sm:$0xff] }
 0x210   : > { %v1897_v3 = vadd.f32 %v1813_v12, %v3985_v17  ;;  %v2226_v34 = vld [vmem:[#allocation2 + $0x151] sm:$0xff] }
 0x211   : > { %v2453_v16 = vadd.f32 %v2367_v23, %v2175_v49  ;;  %v2913_v49 = vld [vmem:[%s3433_s11 + $0xe0] sm:$0xff] }
 0x212   : > { %3108 = vmatmul.msk.f32.gmra.mxu1 %vm202_vm1, %v1667_v27  ;;  %244 = vst.msk [vmem:[#allocation2 + $0x199] sm:$0xff] %vm202_vm1, %v2913_v49  ;;  %v1951_v49 = vld [vmem:[#allocation2 + $0x170] sm:$0xff] }
 0x213   : > { %v2731_v58 = vadd.f32 %v2645_v47, %v2453_v16  ;;  %3142 = vmatmul.msk.f32.gmra.mxu2 %vm202_vm1, %v1946_v26  ;;  %v1669_v47 = vld [vmem:[#allocation2 + $0x13a] sm:$0xff] }
 0x214   : > { %3176 = vmatmul.msk.f32.gmra.mxu3 %vm202_vm1, %v2224_v55  ;;  %v2648_v11 = vpop.f32.mrf.mxu0 }
 0x215   : > { %v2767_v22 = vadd.f32 %v4274_v41, %v2731_v58  ;;  %v1670_v58 = vld [vmem:[#allocation2 + $0x142] sm:$0xff] }
 0x216   : > { %v2092_v59 = vpop.f32.mrf.mxu2 }
 0x217   : > { %2799 = vst [vmem:[%s4281_s6 + $0x28] sm:$0xff] %v2767_v22  ;;  %v2176_v28 = vadd.f32 %v2092_v59, %v1897_v3  ;;  %v1816_v32 = vpop.f32.mrf.mxu1  ;;  %v2370_v57 = vpop.f32.mrf.mxu3  ;;  %3210 = vmatmul.msk.f32.gmra.mxu0 %vm202_vm1, %v4020_v62  ;;  %v2227_v22 = vld [vmem:[#allocation2 + $0x159] sm:$0xff] }
 0x218   : > { %v1898_v6 = vadd.f32 %v1816_v32, %v3997_v50  ;;  %v299_v32 = vld [vmem:[#allocation2 + $0x18f] sm:$0x1] }
 0x219   : > { %v2454_v18 = vadd.f32 %v2370_v57, %v2176_v28  ;;  %v263_v59 = vld [vmem:[#allocation2 + $0x19a] sm:$0x1]  ;;  %317 = vst.msk [vmem:[#allocation2 + $0x191] sm:$0x1] %vm264_vm2, %v299_v32 }
 0x21a   : > { %3109 = vmatmul.msk.f32.gmra.mxu1 %vm202_vm1, %v1668_v1  ;;  %282 = vst.msk [vmem:[#allocation2 + $0x198] sm:$0x1] %vm264_vm2, %v263_v59  ;;  %v2508_v59 = vld [vmem:[#allocation2 + $0x182] sm:$0xff] }
 0x21b   : > { %v2732_v0 = vadd.f32 %v2648_v11, %v2454_v18  ;;  %3143 = vmatmul.msk.f32.gmra.mxu2 %vm202_vm1, %v1947_v48  ;;  %v1949_v11 = vld [vmem:[#allocation2 + $0x158] sm:$0xff] }
 0x21c   : > { %3177 = vmatmul.msk.f32.gmra.mxu3 %vm202_vm1, %v2225_v35  ;;  %v2651_v17 = vpop.f32.mrf.mxu0 }
 0x21d   : > { %v2768_v31 = vadd.f32 %v4274_v41, %v2732_v0  ;;  %v1671_v0 = vld [vmem:[#allocation2 + $0x152] sm:$0xff] }
 0x21e   : > { %v2095_v8 = vpop.f32.mrf.mxu2 }
 0x21f   : > { %2800 = vst [vmem:[%s4281_s6 + $0x30] sm:$0xff] %v2768_v31  ;;  %v2177_v20 = vadd.f32 %v2095_v8, %v1898_v6  ;;  %v1819_v62 = vpop.f32.mrf.mxu1  ;;  %v2373_v43 = vpop.f32.mrf.mxu3  ;;  %3211 = vmatmul.msk.f32.gmra.mxu0 %vm202_vm1, %v4034_v51  ;;  %v2228_v31 = vld [vmem:[#allocation2 + $0x169] sm:$0xff] }
 0x220   : > { %v1899_v23 = vadd.f32 %v1819_v62, %v4011_v44 }
 0x221   : > { %v2455_v63 = vadd.f32 %v2373_v43, %v2177_v20 }
 0x222   : > { %3110 = vmatmul.msk.f32.gmra.mxu1 %vm202_vm1, %v1669_v47 }
 0x223   : > { %v2733_v12 = vadd.f32 %v2651_v17, %v2455_v63  ;;  %3144 = vmatmul.msk.f32.gmra.mxu2 %vm202_vm1, %v1948_v56  ;;  %v1950_v17 = vld [vmem:[#allocation2 + $0x168] sm:$0xff] }
 0x224   : > { %3178 = vmatmul.msk.f32.gmra.mxu3 %vm202_vm1, %v2226_v34  ;;  %v2654_v50 = vpop.f32.mrf.mxu0  ;;  %v1672_v34 = vld [vmem:[#allocation2 + $0x15a] sm:$0xff] }
 0x225   : > { %v2769_v27 = vadd.f32 %v4274_v41, %v2733_v12 }
 0x226   : > { %v2098_v26 = vpop.f32.mrf.mxu2 }
 0x227   : > { %2801 = vst [vmem:[%s4281_s6 + $0x38] sm:$0xff] %v2769_v27  ;;  %v2178_v51 = vadd.f32 %v2098_v26, %v1899_v23  ;;  %v1822_v16 = vpop.f32.mrf.mxu1  ;;  %v2376_v55 = vpop.f32.mrf.mxu3  ;;  %3212 = vmatmul.msk.f32.gmra.mxu0 %vm202_vm1, %v4045_v7 }
 0x228   : > { %v1900_v57 = vadd.f32 %v1822_v16, %v4023_v14  ;;  %v2914_v14 = vld [vmem:[%s3433_s11 + $0xe8] sm:$0xff]  ;;  %s2839_s11 = sshll.u32 %s4281_s6, 4  ;;  %s2840_s11 = int_to_ptr.vmem [resolvable:$true] %s2839_s11 }
 0x229   : > { %v2456_v3 = vadd.f32 %v2376_v55, %v2178_v51  ;;  %245 = vst.msk [vmem:[#allocation2 + $0x1a1] sm:$0xff] %vm202_vm1, %v2914_v14 }
 0x22a   : > { %3111 = vmatmul.msk.f32.gmra.mxu1 %vm202_vm1, %v1670_v58 }
 0x22b   : > { %v2734_v28 = vadd.f32 %v2654_v50, %v2456_v3  ;;  %3145 = vmatmul.msk.f32.gmra.mxu2 %vm202_vm1, %v1949_v11  ;;  %v2229_v50 = vld [vmem:[#allocation2 + $0x171] sm:$0xff] }
 0x22c   : > { %3179 = vmatmul.msk.f32.gmra.mxu3 %vm202_vm1, %v2227_v22  ;;  %v2657_v44 = vpop.f32.mrf.mxu0  ;;  %v1673_v11 = vld [vmem:[#allocation2 + $0x16a] sm:$0xff] }
 0x22d   : > { %v2770_v7 = vadd.f32 %v4274_v41, %v2734_v28 }
 0x22e   : > { %v2101_v1 = vpop.f32.mrf.mxu2 }
 0x22f   : > { %2802 = vst [vmem:[%s4281_s6 + $0x40] sm:$0xff] %v2770_v7  ;;  %v2179_v48 = vadd.f32 %v2101_v1, %v1900_v57  ;;  %v1825_v18 = vpop.f32.mrf.mxu1  ;;  %v2379_v35 = vpop.f32.mrf.mxu3  ;;  %3213 = vmatmul.msk.f32.gmra.mxu0 %vm202_vm1, %v4056_v54 }
 0x230   : > { %v1901_v62 = vadd.f32 %v1825_v18, %v4037_v21  ;;  %v300_v27 = vld [vmem:[#allocation2 + $0x1a7] sm:$0x1]  ;;  %v4578_v18 = vld [vmem:[#allocation35_spill] sm:$0xff] }
 0x231   : > { %v2457_v6 = vadd.f32 %v2379_v35, %v2179_v48  ;;  %318 = vst.msk [vmem:[#allocation2 + $0x1a9] sm:$0x1] %vm264_vm2, %v300_v27 }
 0x232   : > { %3112 = vmatmul.msk.f32.gmra.mxu1 %vm202_vm1, %v1671_v0 }
 0x233   : > { %v2735_v8 = vadd.f32 %v2657_v44, %v2457_v6  ;;  %3146 = vmatmul.msk.f32.gmra.mxu2 %vm202_vm1, %v1950_v17 }
 0x234   : > { %3180 = vmatmul.msk.f32.gmra.mxu3 %vm202_vm1, %v2228_v31  ;;  %v2660_v20 = vpop.f32.mrf.mxu0 }
 0x235   : > { %v2771_v43 = vadd.f32 %v4274_v41, %v2735_v8 }
 0x236   : > { %v2104_v47 = vpop.f32.mrf.mxu2 }
 0x237   : > { %2803 = vst [vmem:[%s4281_s6 + $0x48] sm:$0xff] %v2771_v43  ;;  %v2180_v54 = vadd.f32 %v2104_v47, %v1901_v62  ;;  %v1828_v56 = vpop.f32.mrf.mxu1  ;;  %v2382_v63 = vpop.f32.mrf.mxu3  ;;  %3214 = vmatmul.msk.f32.gmra.mxu0 %vm202_vm1, %v4067_v13  ;;  %v2510_v62 = vld [vmem:[#allocation2 + $0x19a] sm:$0xff] }
 0x238   : > { %v1902_v26 = vadd.f32 %v1828_v56, %v4048_v4  ;;  %v4579_v43 = vld [vmem:[#allocation36_spill] sm:$0xff] }
 0x239   : > { %v2458_v12 = vadd.f32 %v2382_v63, %v2180_v54 }
 0x23a   : > { %3113 = vmatmul.msk.f32.gmra.mxu1 %vm202_vm1, %v1672_v34 }
 0x23b   : > { %v2736_v23 = vadd.f32 %v2660_v20, %v2458_v12  ;;  %3147 = vmatmul.msk.f32.gmra.mxu2 %vm202_vm1, %v1951_v49  ;;  %v1955_v12 = vld [vmem:[#allocation2 + $0x1a0] sm:$0xff] }
 0x23c   : > { %3181 = vmatmul.msk.f32.gmra.mxu3 %vm202_vm1, %v2229_v50  ;;  %v2663_v21 = vpop.f32.mrf.mxu0 }
 0x23d   : > { %v2772_v51 = vadd.f32 %v4274_v41, %v2736_v23  ;;  %v2233_v23 = vld [vmem:[#allocation2 + $0x1a1] sm:$0xff] }
 0x23e   : > { %v2107_v16 = vpop.f32.mrf.mxu2 }
 0x23f   : > { %2804 = vst [vmem:[%s4281_s6 + $0x50] sm:$0xff] %v2772_v51  ;;  %v2181_v13 = vadd.f32 %v2107_v16, %v1902_v26  ;;  %v1831_v55 = vpop.f32.mrf.mxu1  ;;  %v2385_v58 = vpop.f32.mrf.mxu3  ;;  %3215 = vmatmul.msk.f32.gmra.mxu0 %vm202_vm1, %v4083_v25  ;;  %v2511_v26 = vld [vmem:[#allocation2 + $0x1a2] sm:$0xff] }
 0x240   : > { %v1903_v28 = vadd.f32 %v1831_v55, %v4059_v19 }
 0x241   : > { %v2459_v3 = vadd.f32 %v2385_v58, %v2181_v13 }
 0x242   : > { %3114 = vmatmul.msk.f32.gmra.mxu1 %vm202_vm1, %v1673_v11 }
 0x243   : > { %v2737_v22 = vadd.f32 %v2663_v21, %v2459_v3  ;;  %3148 = vmatmul.msk.f32.gmra.mxu2 %vm202_vm1, %v4069_v46 }
 0x244   : > { %3182 = vmatmul.msk.f32.gmra.mxu3 %vm202_vm1, %v4078_v29  ;;  %v2666_v4 = vpop.f32.mrf.mxu0  ;;  %v2509_v29 = vld [vmem:[#allocation2 + $0x18a] sm:$0xff] }
 0x245   : > { %v2773_v44 = vadd.f32 %v4274_v41, %v2737_v22 }
 0x246   : > { %v2110_v32 = vpop.f32.mrf.mxu2 }
 0x247   : > { %2805 = vst [vmem:[%s4281_s6 + $0x58] sm:$0xff] %v2773_v44  ;;  %v2182_v57 = vadd.f32 %v2110_v32, %v1903_v28  ;;  %v1834_v7 = vpop.f32.mrf.mxu1  ;;  %v2388_v1 = vpop.f32.mrf.mxu3  ;;  %3216 = vmatmul.msk.f32.gmra.mxu0 %vm202_vm1, %v2508_v59 }
 0x248   : > { %v1904_v35 = vadd.f32 %v1834_v7, %v4578_v18 }
 0x249   : > { %v2460_v48 = vadd.f32 %v2388_v1, %v2182_v57 }
 0x24a   : > { %3115 = vmatmul.msk.f32.gmra.mxu1 %vm202_vm1, %v4083_v25  ;;  %v1954_v25 = vld [vmem:[#allocation2 + $0x198] sm:$0xff] }
 0x24b   : > { %v2738_v46 = vadd.f32 %v2666_v4, %v2460_v48  ;;  %3149 = vmatmul.msk.f32.gmra.mxu2 %vm202_vm1, %v4085_v9  ;;  %v2232_v9 = vld [vmem:[#allocation2 + $0x199] sm:$0xff] }
 0x24c   : > { %3183 = vmatmul.msk.f32.gmra.mxu3 %vm202_vm1, %v4094_v39  ;;  %v2669_v19 = vpop.f32.mrf.mxu0 }
 0x24d   : > { %v2774_v0 = vadd.f32 %v4274_v41, %v2738_v46 }
 0x24e   : > { %v2113_v17 = vpop.f32.mrf.mxu2 }
 0x24f   : > { %2806 = vst [vmem:[%s4281_s6 + $0x60] sm:$0xff] %v2774_v0  ;;  %v2183_v6 = vadd.f32 %v2113_v17, %v1904_v35  ;;  %v1837_v31 = vpop.f32.mrf.mxu1  ;;  %v2391_v14 = vpop.f32.mrf.mxu3  ;;  %3217 = vmatmul.msk.f32.gmra.mxu0 %vm202_vm1, %v2509_v29 }
 0x250   : > { %v1905_v47 = vadd.f32 %v1837_v31, %v4579_v43 }
 0x251   : > { %v2461_v8 = vadd.f32 %v2391_v14, %v2183_v6 }
 0x252   : > { %3116 = vmatmul.msk.f32.gmra.mxu1 %vm202_vm1, %v2508_v59 }
 0x253   : > { %v2739_v39 = vadd.f32 %v2669_v19, %v2461_v8  ;;  %3150 = vmatmul.msk.f32.gmra.mxu2 %vm202_vm1, %v1954_v25 }
 0x254   : > { %3184 = vmatmul.msk.f32.gmra.mxu3 %vm202_vm1, %v2232_v9  ;;  %v2672_v20 = vpop.f32.mrf.mxu0 }
 0x255   : > { %v2775_v54 = vadd.f32 %v4274_v41, %v2739_v39 }
 0x256   : > { %v2116_v56 = vpop.f32.mrf.mxu2 }
 0x257   : > { %2807 = vst [vmem:[%s4281_s6 + $0x68] sm:$0xff] %v2775_v54  ;;  %v2184_v63 = vadd.f32 %v2116_v56, %v1905_v47  ;;  %v1840_v34 = vpop.f32.mrf.mxu1  ;;  %v2394_v49 = vpop.f32.mrf.mxu3  ;;  %3218 = vmatmul.msk.f32.gmra.mxu0 %vm202_vm1, %v2510_v62 }
 0x258   : > { %v1906_v51 = vadd.f32 %v1840_v34, %v4101_v53 }
 0x259   : > { %v2462_v50 = vadd.f32 %v2394_v49, %v2184_v63 }
 0x25a   : > { %3117 = vmatmul.msk.f32.gmra.mxu1 %vm202_vm1, %v2509_v29 }
 0x25b   : > { %v2740_v21 = vadd.f32 %v2672_v20, %v2462_v50  ;;  %3151 = vmatmul.msk.f32.gmra.mxu2 %vm202_vm1, %v1955_v12 }
 0x25c   : > { %3185 = vmatmul.msk.f32.gmra.mxu3 %vm202_vm1, %v2233_v23  ;;  %v2675_v27 = vpop.f32.mrf.mxu0 }
 0x25d   : > { %v2776_v16 = vadd.f32 %v4274_v41, %v2740_v21 }
 0x25e   : > { %v2119_v13 = vpop.f32.mrf.mxu2 }
 0x25f   : > { %2808 = vst [vmem:[%s4281_s6 + $0x70] sm:$0xff] %v2776_v16  ;;  %v2185_v55 = vadd.f32 %v2119_v13, %v1906_v51  ;;  %v1843_v58 = vpop.f32.mrf.mxu1  ;;  %v2397_v11 = vpop.f32.mrf.mxu3  ;;  %3219 = vmatmul.msk.f32.gmra.mxu0 %vm202_vm1, %v2511_v26 }
 0x260   : > { %v1907_v59 = vadd.f32 %v1843_v58, %v4111_v24 }
 0x261   : > { %v2463_v3 = vadd.f32 %v2397_v11, %v2185_v55 }
 0x263   : > { %v2741_v22 = vadd.f32 %v2675_v27, %v2463_v3 }
 0x264   : > { %v2678_v4 = vpop.f32.mrf.mxu0 }
 0x265   : > { %v2777_v28 = vadd.f32 %v4274_v41, %v2741_v22 }
 0x266   : > { %v2122_v44 = vpop.f32.mrf.mxu2 }
 0x267   : > { %2809 = vst [vmem:[%s4281_s6 + $0x78] sm:$0xff] %v2777_v28  ;;  %v2186_v53 = vadd.f32 %v2122_v44, %v1907_v59  ;;  %v1846_v32 = vpop.f32.mrf.mxu1  ;;  %v2400_v57 = vpop.f32.mrf.mxu3 }
 0x268   : > { %v1908_v46 = vadd.f32 %v1846_v32, %v4121_v30 }
 0x269   : > { %v2464_v7 = vadd.f32 %v2400_v57, %v2186_v53 }
 0x26b   : > { %v2742_v1 = vadd.f32 %v2678_v4, %v2464_v7 }
 0x26c   : > { %v2681_v48 = vpop.f32.mrf.mxu0 }
 0x26d   : > { %v2778_v19 = vadd.f32 %v4274_v41, %v2742_v1 }
 0x26e   : > { %v2125_v29 = vpop.f32.mrf.mxu2 }
 0x26f   : > { %2810 = vst [vmem:[%s4281_s6 + $0x80] sm:$0xff] %v2778_v19  ;;  %v2187_v18 = vadd.f32 %v2125_v29, %v1908_v46  ;;  %v1849_v35 = vpop.f32.mrf.mxu1  ;;  %v2403_v24 = vpop.f32.mrf.mxu3 }
 0x270   : > { %v1909_v31 = vadd.f32 %v1849_v35, %v4131_v33 }
 0x271   : > { %v2465_v0 = vadd.f32 %v2403_v24, %v2187_v18 }
 0x273   : > { %v2743_v17 = vadd.f32 %v2681_v48, %v2465_v0 }
 0x274   : > { %v2684_v6 = vpop.f32.mrf.mxu0 }
 0x275   : > { %v2779_v14 = vadd.f32 %v4274_v41, %v2743_v17 }
 0x276   : > { %v2128_v25 = vpop.f32.mrf.mxu2 }
 0x277   : > { %2811 = vst [vmem:[%s4281_s6 + $0x88] sm:$0xff] %v2779_v14  ;;  %v2188_v8 = vadd.f32 %v2128_v25, %v1909_v31  ;;  %v1852_v9 = vpop.f32.mrf.mxu1  ;;  %v2406_v30 = vpop.f32.mrf.mxu3 }
 0x278   : > { %v1910_v43 = vadd.f32 %v1852_v9, %v4141_v37 }
 0x279   : > { %v2466_v39 = vadd.f32 %v2406_v30, %v2188_v8 }
 0x27b   : > { %v2744_v20 = vadd.f32 %v2684_v6, %v2466_v39 }
 0x27c   : > { %v2687_v62 = vpop.f32.mrf.mxu0 }
 0x27d   : > { %v2780_v47 = vadd.f32 %v4274_v41, %v2744_v20 }
 0x27e   : > { %v2131_v54 = vpop.f32.mrf.mxu2 }
 0x27f   : > { %2812 = vst [vmem:[%s4281_s6 + $0x90] sm:$0xff] %v2780_v47  ;;  %v2189_v56 = vadd.f32 %v2131_v54, %v1910_v43  ;;  %v1855_v63 = vpop.f32.mrf.mxu1  ;;  %v2409_v33 = vpop.f32.mrf.mxu3 }
 0x280   : > { %v1911_v50 = vadd.f32 %v1855_v63, %v4151_v42 }
 0x281   : > { %v2467_v34 = vadd.f32 %v2409_v33, %v2189_v56 }
 0x283   : > { %v2745_v49 = vadd.f32 %v2687_v62, %v2467_v34 }
 0x284   : > { %v2690_v12 = vpop.f32.mrf.mxu0 }
 0x285   : > { %v2781_v23 = vadd.f32 %v4274_v41, %v2745_v49 }
 0x286   : > { %v2134_v21 = vpop.f32.mrf.mxu2 }
 0x287   : > { %2813 = vst [vmem:[%s4281_s6 + $0x98] sm:$0xff] %v2781_v23  ;;  %v2190_v27 = vadd.f32 %v2134_v21, %v1911_v50  ;;  %v1858_v26 = vpop.f32.mrf.mxu1  ;;  %v2412_v37 = vpop.f32.mrf.mxu3 }
 0x288   : > { %v1912_v55 = vadd.f32 %v1858_v26, %v4161_v45 }
 0x289   : > { %v2468_v51 = vadd.f32 %v2412_v37, %v2190_v27 }
 0x28b   : > { %v2746_v16 = vadd.f32 %v2690_v12, %v2468_v51 }
 0x28c   : > { %v2693_v13 = vpop.f32.mrf.mxu0 }
 0x28d   : > { %v2782_v58 = vadd.f32 %v4274_v41, %v2746_v16 }
 0x28e   : > { %v2137_v11 = vpop.f32.mrf.mxu2 }
 0x28f   : > { %2814 = vst [vmem:[%s4281_s6 + $0xa0] sm:$0xff] %v2782_v58  ;;  %v2191_v3 = vadd.f32 %v2137_v11, %v1912_v55  ;;  %v1861_v22 = vpop.f32.mrf.mxu1  ;;  %v2415_v42 = vpop.f32.mrf.mxu3 }
 0x290   : > { %v1913_v44 = vadd.f32 %v1861_v22, %v4171_v15 }
 0x291   : > { %v2469_v4 = vadd.f32 %v2415_v42, %v2191_v3 }
 0x293   : > { %v2747_v59 = vadd.f32 %v2693_v13, %v2469_v4 }
 0x294   : > { %v2696_v28 = vpop.f32.mrf.mxu0 }
 0x295   : > { %v2783_v53 = vadd.f32 %v4274_v41, %v2747_v59 }
 0x296   : > { %v2140_v32 = vpop.f32.mrf.mxu2 }
 0x297   : > { %2815 = vst [vmem:[%s4281_s6 + $0xa8] sm:$0xff] %v2783_v53  ;;  %v2192_v57 = vadd.f32 %v2140_v32, %v1913_v44  ;;  %v1864_v7 = vpop.f32.mrf.mxu1  ;;  %v2418_v45 = vpop.f32.mrf.mxu3 }
 0x298   : > { %v1914_v19 = vadd.f32 %v1864_v7, %v4181_v60 }
 0x299   : > { %v2470_v1 = vadd.f32 %v2418_v45, %v2192_v57 }
 0x29b   : > { %v2748_v48 = vadd.f32 %v2696_v28, %v2470_v1 }
 0x29c   : > { %v2699_v46 = vpop.f32.mrf.mxu0 }
 0x29d   : > { %v2784_v29 = vadd.f32 %v4274_v41, %v2748_v48 }
 0x29e   : > { %v2143_v18 = vpop.f32.mrf.mxu2 }
 0x29f   : > { %2816 = vst [vmem:[%s4281_s6 + $0xb0] sm:$0xff] %v2784_v29  ;;  %v2193_v35 = vadd.f32 %v2143_v18, %v1914_v19  ;;  %v1867_v24 = vpop.f32.mrf.mxu1  ;;  %v2421_v15 = vpop.f32.mrf.mxu3 }
 0x2a0   : > { %v1915_v31 = vadd.f32 %v1867_v24, %v4191_v40 }
 0x2a1   : > { %v2471_v0 = vadd.f32 %v2421_v15, %v2193_v35 }
 0x2a3   : > { %v2749_v17 = vadd.f32 %v2699_v46, %v2471_v0 }
 0x2a4   : > { %v2702_v6 = vpop.f32.mrf.mxu0 }
 0x2a5   : > { %v2785_v14 = vadd.f32 %v4274_v41, %v2749_v17 }
 0x2a6   : > { %v2146_v25 = vpop.f32.mrf.mxu2 }
 0x2a7   : > { %2817 = vst [vmem:[%s4281_s6 + $0xb8] sm:$0xff] %v2785_v14  ;;  %v2194_v8 = vadd.f32 %v2146_v25, %v1915_v31  ;;  %v1870_v9 = vpop.f32.mrf.mxu1  ;;  %v2424_v60 = vpop.f32.mrf.mxu3 }
 0x2a8   : > { %v1916_v62 = vadd.f32 %v1870_v9, %v4201_v10 }
 0x2a9   : > { %v2472_v30 = vadd.f32 %v2424_v60, %v2194_v8 }
 0x2ab   : > { %v2750_v39 = vadd.f32 %v2702_v6, %v2472_v30 }
 0x2ac   : > { %v2705_v20 = vpop.f32.mrf.mxu0 }
 0x2ad   : > { %v2786_v43 = vadd.f32 %v4274_v41, %v2750_v39 }
 0x2ae   : > { %v2149_v47 = vpop.f32.mrf.mxu2 }
 0x2af   : > { %2818 = vst [vmem:[%s4281_s6 + $0xc0] sm:$0xff] %v2786_v43  ;;  %v2195_v54 = vadd.f32 %v2149_v47, %v1916_v62  ;;  %v1873_v56 = vpop.f32.mrf.mxu1  ;;  %v2427_v40 = vpop.f32.mrf.mxu3 }
 0x2b0   : > { %v1917_v49 = vadd.f32 %v1873_v56, %v4211_v36 }
 0x2b1   : > { %v2473_v63 = vadd.f32 %v2427_v40, %v2195_v54 }
 0x2b3   : > { %v2751_v33 = vadd.f32 %v2705_v20, %v2473_v63 }
 0x2b4   : > { %v2708_v34 = vpop.f32.mrf.mxu0 }
 0x2b5   : > { %v2787_v12 = vadd.f32 %v4274_v41, %v2751_v33 }
 0x2b6   : > { %v2152_v50 = vpop.f32.mrf.mxu2 }
 0x2b7   : > { %2819 = vst [vmem:[%s4281_s6 + $0xc8] sm:$0xff] %v2787_v12  ;;  %v2196_v23 = vadd.f32 %v2152_v50, %v1917_v49  ;;  %v1876_v21 = vpop.f32.mrf.mxu1  ;;  %v2430_v10 = vpop.f32.mrf.mxu3 }
 0x2b8   : > { %v1918_v51 = vadd.f32 %v1876_v21, %v4221_v38 }
 0x2b9   : > { %v2474_v27 = vadd.f32 %v2430_v10, %v2196_v23 }
 0x2bb   : > { %v2752_v26 = vadd.f32 %v2708_v34, %v2474_v27 }
 0x2bc   : > { %v2711_v37 = vpop.f32.mrf.mxu0 }
 0x2bd   : > { %v2788_v16 = vadd.f32 %v4274_v41, %v2752_v26 }
 0x2be   : > { %v2155_v13 = vpop.f32.mrf.mxu2 }
 0x2bf   : > { %2820 = vst [vmem:[%s4281_s6 + $0xd0] sm:$0xff] %v2788_v16  ;;  %v2197_v55 = vadd.f32 %v2155_v13, %v1918_v51  ;;  %v1879_v58 = vpop.f32.mrf.mxu1  ;;  %v2433_v36 = vpop.f32.mrf.mxu3 }
 0x2c0   : > { %v1919_v42 = vadd.f32 %v1879_v58, %v4231_v61 }
 0x2c1   : > { %v2475_v11 = vadd.f32 %v2433_v36, %v2197_v55 }
 0x2c3   : > { %v2753_v3 = vadd.f32 %v2711_v37, %v2475_v11 }
 0x2c4   : > { %v2714_v22 = vpop.f32.mrf.mxu0 }
 0x2c5   : > { %v2789_v4 = vadd.f32 %v4274_v41, %v2753_v3 }
 0x2c6   : > { %v2158_v59 = vpop.f32.mrf.mxu2 }
 0x2c7   : > { %2821 = vst [vmem:[%s4281_s6 + $0xd8] sm:$0xff] %v2789_v4  ;;  %v2198_v28 = vadd.f32 %v2158_v59, %v1919_v42  ;;  %v1882_v44 = vpop.f32.mrf.mxu1  ;;  %v2436_v38 = vpop.f32.mrf.mxu3 }
 0x2c8   : > { %v1920_v7 = vadd.f32 %v1882_v44, %v4240_v2 }
 0x2c9   : > { %v2476_v53 = vadd.f32 %v2436_v38, %v2198_v28 }
 0x2cb   : > { %v2754_v32 = vadd.f32 %v2714_v22, %v2476_v53 }
 0x2cc   : > { %v2717_v57 = vpop.f32.mrf.mxu0 }
 0x2cd   : > { %v2790_v45 = vadd.f32 %v4274_v41, %v2754_v32 }
 0x2ce   : > { %v2161_v1 = vpop.f32.mrf.mxu2 }
 0x2cf   : > { %2822 = vst [vmem:[%s4281_s6 + $0xe0] sm:$0xff] %v2790_v45  ;;  %v2199_v48 = vadd.f32 %v2161_v1, %v1920_v7  ;;  %v2439_v61 = vpop.f32.mrf.mxu3  ;;  %v1885_v46 = vpop.f32.mrf.mxu1 }
 0x2d0   : > { %v1921_v18 = vadd.f32 %v1885_v46, %v4250_v5 }
 0x2d1   : > { %v2477_v19 = vadd.f32 %v2439_v61, %v2199_v48 }
 0x2d3   : > { %v2755_v29 = vadd.f32 %v2717_v57, %v2477_v19 }
 0x2d4   : > { %v2720_v15 = vpop.f32.mrf.mxu0 }
 0x2d5   : > { %v2791_v35 = vadd.f32 %v4274_v41, %v2755_v29 }
 0x2d6   : > { %v2164_v24 = vpop.f32.mrf.mxu2 }
 0x2d7   : > { %2823 = vst [vmem:[%s4281_s6 + $0xe8] sm:$0xff] %v2791_v35  ;;  %v2200_v2 = vadd.f32 %v2164_v24, %v1921_v18  ;;  %v2442_v0 = vpop.f32.mrf.mxu3  ;;  %v1888_v6 = vpop.f32.mrf.mxu1 }
 0x2d8   : > { %v1922_v14 = vadd.f32 %v1888_v6, %v4260_v52 }
 0x2d9   : > { %v2478_v17 = vadd.f32 %v2442_v0, %v2200_v2 }
 0x2db   : > { %v2756_v31 = vadd.f32 %v2720_v15, %v2478_v17 }
 0x2dc   : > { %v2723_v60 = vpop.f32.mrf.mxu0 }
 0x2dd   : > { %v2792_v25 = vadd.f32 %v4274_v41, %v2756_v31 }
 0x2de   : > { %v2167_v8 = vpop.f32.mrf.mxu2 }
 0x2df   : > { %2824 = vst [vmem:[%s4281_s6 + $0xf0] sm:$0xff] %v2792_v25  ;;  %v2201_v5 = vadd.f32 %v2167_v8, %v1922_v14  ;;  %v2445_v9 = vpop.f32.mrf.mxu3 }
 0x2e1   : > { %v2479_v30 = vadd.f32 %v2445_v9, %v2201_v5 }
 0x2e3   : > { %v2757_v39 = vadd.f32 %v2723_v60, %v2479_v30 }
 0x2e5   : > { %v2793_v52 = vadd.f32 %v4274_v41, %v2757_v39 }
 0x2e7   : > { %2825 = vst [vmem:[%s4281_s6 + $0xf8] sm:$0xff] %v2793_v52 }
 0x2e8   : > { %3299 = shalt.err (!%p3296_p3)
}
 0x2e9   : > { %s3336_s29 = smov 128   ;;  %s3337_s30 = smov 8  }
 0x2ea   : > { %3230 = dma.vmem_to_hbm [thread:$0]  (%p3396_p5), %s2840_s11, 4096, %s2842_s17, %s2827_s16, %s3336_s29, %s3336_s29, %s3337_s30  }
 0x2eb PF: > { %p3236_p4 = scmp.ge.s32.totalorder %s3334_s15, 2  ;;  %s2856_s4 = sand.u32 1, %s3322_s12  }
 0x2ec   : > { %s2857_s5 = scalar_lea.sflag [#allocation4], %s2856_s4 }
 0x2ed   : > { %p3233_p7 = pnand %p3236_p4, %p3400_p6 }
 0x2ef   : > { %p3234_p8 = pneg %p3233_p7 }
 0x2f1   : > { %3317 = dma.done.wait (%p3234_p8), %s2857_s5, 4096  }
 0x2f2   : > { %3319 = vsyncadd (%p3234_p8), %s2857_s5, 4294963200  ;;  %p13_p9 = scmp.ge.s32.totalorder %s3383_s18, 4   ;;  %s4580_s12 = smov %s3326_s13 }
 0x2f3   : > { %s4581_s13 = smov %s3330_s14  ;;  %s4582_s14 = smov %s3394_s21 }
 0x2f4   : > { %s4583_s15 = smov %s3383_s18  ;;  %15 = sbr.rel (!%p13_p9) target bundleno = 3 (0x3), region = 80 }
 0x2f9   :  { %2863 = vsyncpa [#allocation4], 1 }
 0x2fa   :  { %2865 = vsyncpa [#allocation4 + $0x1], 1 }

</bundles_post_ra>
